<compile_context>
chip_gen: v7x
topology: tpu7x:2x2x1
jax: 0.10.0
libtpu: 0.0.40
codegen_flags: <defaults>
</compile_context>

<pallas_src>
import math

import jax
import jax.numpy as jnp
from jax import lax
from jax.experimental import pallas as pl
from jax.experimental.pallas import tpu as pltpu


# ---------------------------------------------------------------------------
# model hyper-params (small, consistent with the module's forward signature)
# ---------------------------------------------------------------------------
BATCH = 2
SEQ = 8
D_EMBD = 32
N_HEADS = 4
HEAD_DIM = D_EMBD // N_HEADS
D_FF = 64
N_BLOCK = 2
LN_EPS = 1e-5

BS = BATCH * SEQ                     # tokens processed per block
W_COLS = 3 * D_EMBD + D_EMBD + D_FF  # packed weight slab cols: [wqkv | wo | w1] = 192
B_COLS = 3 * D_EMBD                  # packed bias/LN slab row width = 96
NEG_INF = -1e9


def _gelu_tanh(x):
    c = math.sqrt(2.0 / math.pi)
    return 0.5 * x * (1.0 + jnp.tanh(c * (x + 0.044715 * x * x * x)))


# ---------------------------------------------------------------------------
# fused encoder kernel: single invocation, static loop over blocks, activations
# stay in registers/VMEM the whole time.
# ---------------------------------------------------------------------------
def encoder_kernel(x_ref, nbias_ref, hmask_ref, wa_ref, wb_ref, bias_ref, out_ref):
    h = x_ref[...]                          # (BS, D) f32 resident activation
    neg_bias = nbias_ref[...]               # (H*BS, BS) f32, block-invariant
    hm = hmask_ref[...]                     # (H, D)    f32, per-head column masks

    scale = 1.0 / math.sqrt(HEAD_DIM)

    for blk in range(N_BLOCK):              # static unroll; weights fit VMEM trivially
        wa = wa_ref[blk]                    # (D, W_COLS) bf16 = [wqkv | wo | w1]
        w2 = wb_ref[blk]                    # (D_FF, D)   bf16
        bsl = bias_ref[blk]                 # (8, B_COLS) f32 bias/LN rows

        wqkv = wa[:, 0:3 * D_EMBD]                       # (D, 3D)
        wo = wa[:, 3 * D_EMBD:4 * D_EMBD]                # (D, D)
        w1 = wa[:, 4 * D_EMBD:4 * D_EMBD + D_FF]         # (D, D_FF)

        bqkv = bsl[0:1, :]                               # (1, 3D)
        bo = bsl[1:2, 0:D_EMBD]
        b1 = bsl[2:3, 0:D_FF]
        b2 = bsl[3:4, 0:D_EMBD]
        ln1g = bsl[4:5, 0:D_EMBD]
        ln1b = bsl[5:6, 0:D_EMBD]
        ln2g = bsl[6:7, 0:D_EMBD]
        ln2b = bsl[7:8, 0:D_EMBD]

        # ---- fused QKV projection (bf16 operands, f32 accumulation) --------
        qkv = jnp.dot(h.astype(jnp.bfloat16), wqkv,
                      preferred_element_type=jnp.float32) + bqkv     # (BS, 3D)
        q = qkv[:, 0:D_EMBD]
        k = qkv[:, D_EMBD:2 * D_EMBD]
        v = qkv[:, 2 * D_EMBD:3 * D_EMBD]

        # ---- batched multi-head attention: all heads in one operand --------
        # q_stk[h*BS + i, :] = q[i, :] masked to head h's columns
        q_stk = (q[None, :, :] * hm[:, None, :]).reshape(N_HEADS * BS, D_EMBD)
        s = lax.dot_general(q_stk.astype(jnp.bfloat16), k.astype(jnp.bfloat16),
                            (((1,), (1,)), ((), ())),
                            preferred_element_type=jnp.float32) * scale   # (H*BS, BS)
        s = s + neg_bias
        s = s - jnp.max(s, axis=-1, keepdims=True)
        p = jnp.exp(s)
        p = p * pl.reciprocal(jnp.sum(p, axis=-1, keepdims=True), approx=True)

        # p_h @ v then keep only head h's output columns, summed over heads
        ctx_big = jnp.dot(p.astype(jnp.bfloat16), v.astype(jnp.bfloat16),
                          preferred_element_type=jnp.float32)             # (H*BS, D)
        ctx = jnp.sum(ctx_big.reshape(N_HEADS, BS, D_EMBD) * hm[:, None, :],
                      axis=0)                                             # (BS, D)

        attn = jnp.dot(ctx.astype(jnp.bfloat16), wo,
                       preferred_element_type=jnp.float32) + bo

        # ---- residual + LayerNorm 1 ----------------------------------------
        y = h + attn
        mu = jnp.mean(y, axis=-1, keepdims=True)
        yc = y - mu
        var = jnp.mean(yc * yc, axis=-1, keepdims=True)
        y = yc * lax.rsqrt(var + LN_EPS) * ln1g + ln1b

        # ---- feed-forward ----------------------------------------------------
        h1 = jnp.dot(y.astype(jnp.bfloat16), w1,
                     preferred_element_type=jnp.float32) + b1
        h1 = _gelu_tanh(h1)
        ff = jnp.dot(h1.astype(jnp.bfloat16), w2,
                     preferred_element_type=jnp.float32) + b2

        # ---- residual + LayerNorm 2 ------------------------------------------
        z = y + ff
        mu2 = jnp.mean(z, axis=-1, keepdims=True)
        zc = z - mu2
        var2 = jnp.mean(zc * zc, axis=-1, keepdims=True)
        h = zc * lax.rsqrt(var2 + LN_EPS) * ln2g + ln2b

    out_ref[...] = h


# ---------------------------------------------------------------------------
# wrapper: single pallas_call, block-invariant masks precomputed on the host
# ---------------------------------------------------------------------------
def encoder_forward(hidden_states, attention_mask, wa, wb, bias_slab):
    B, S, D = hidden_states.shape
    n_block = wa.shape[0]
    bs = B * S
    x2d = hidden_states.reshape(bs, D).astype(jnp.float32)

    # additive attention bias: block-diag over batch + key padding, tiled per head
    key_keep = attention_mask.reshape(1, bs) > 0.5
    row_b = jnp.arange(bs, dtype=jnp.int32)[:, None] // S
    col_b = jnp.arange(bs, dtype=jnp.int32)[None, :] // S
    allowed = jnp.logical_and(row_b == col_b, key_keep)
    neg_bias = jnp.where(allowed, 0.0, NEG_INF).astype(jnp.float32)       # (BS, BS)
    neg_bias_stk = jnp.tile(neg_bias, (N_HEADS, 1))                        # (H*BS, BS)

    # per-head column masks (H, D)
    col = jnp.arange(D, dtype=jnp.int32)[None, :]
    hid = jnp.arange(N_HEADS, dtype=jnp.int32)[:, None]
    head_mask = ((col >= hid * HEAD_DIM) &
                 (col < (hid + 1) * HEAD_DIM)).astype(jnp.float32)         # (H, D)

    out2d = pl.pallas_call(
        encoder_kernel,
        out_shape=jax.ShapeDtypeStruct((bs, D), jnp.float32),
        grid_spec=pltpu.PrefetchScalarGridSpec(
            num_scalar_prefetch=0,
            grid=(1,),
            in_specs=[
                pl.BlockSpec((bs, D), lambda i: (0, 0)),                   # hidden_states
                pl.BlockSpec((N_HEADS * bs, bs), lambda i: (0, 0)),        # attention bias
                pl.BlockSpec((N_HEADS, D), lambda i: (0, 0)),              # head masks
                pl.BlockSpec((n_block, D, W_COLS), lambda i: (0, 0, 0)),   # [wqkv|wo|w1]
                pl.BlockSpec((n_block, D_FF, D), lambda i: (0, 0, 0)),     # w2
                pl.BlockSpec((n_block, 8, B_COLS), lambda i: (0, 0, 0)),   # biases/LN
            ],
            out_specs=pl.BlockSpec((bs, D), lambda i: (0, 0)),
        ),
        compiler_params=pltpu.CompilerParams(
            dimension_semantics=("arbitrary",)),
    )(x2d, neg_bias_stk, head_mask, wa, wb, bias_slab)
    return out2d.reshape(B, S, D)


# ---------------------------------------------------------------------------
# parameter init (per block) + packing into 3 stacked slabs
# ---------------------------------------------------------------------------
def init_block_params(key):
    ks = jax.random.split(key, 6)
    std = 0.02
    return {
        "wq": jax.random.normal(ks[0], (D_EMBD, D_EMBD), jnp.float32) * std,
        "wk": jax.random.normal(ks[1], (D_EMBD, D_EMBD), jnp.float32) * std,
        "wv": jax.random.normal(ks[2], (D_EMBD, D_EMBD), jnp.float32) * std,
        "wo": jax.random.normal(ks[3], (D_EMBD, D_EMBD), jnp.float32) * std,
        "w1": jax.random.normal(ks[4], (D_EMBD, D_FF), jnp.float32) * std,
        "w2": jax.random.normal(ks[5], (D_FF, D_EMBD), jnp.float32) * std,
        "bq": jnp.zeros((1, D_EMBD), jnp.float32),
        "bk": jnp.zeros((1, D_EMBD), jnp.float32),
        "bv": jnp.zeros((1, D_EMBD), jnp.float32),
        "bo": jnp.zeros((1, D_EMBD), jnp.float32),
        "b1": jnp.zeros((1, D_FF), jnp.float32),
        "b2": jnp.zeros((1, D_EMBD), jnp.float32),
        "ln1_g": jnp.ones((1, D_EMBD), jnp.float32),
        "ln1_b": jnp.zeros((1, D_EMBD), jnp.float32),
        "ln2_g": jnp.ones((1, D_EMBD), jnp.float32),
        "ln2_b": jnp.zeros((1, D_EMBD), jnp.float32),
    }


def pack_block_params(blocks_params):
    def row(v):
        v = v.reshape(1, -1)
        return jnp.pad(v, ((0, 0), (0, B_COLS - v.shape[1])))

    wa_list, wb_list, bias_list = [], [], []
    for p in blocks_params:
        wqkv = jnp.concatenate([p["wq"], p["wk"], p["wv"]], axis=1)        # (D, 3D)
        wa = jnp.concatenate([wqkv, p["wo"], p["w1"]], axis=1)             # (D, 192)
        wa_list.append(wa.astype(jnp.bfloat16))                            # bf16 MXU operands
        wb_list.append(p["w2"].astype(jnp.bfloat16))                       # (D_FF, D) bf16
        bias_rows = jnp.concatenate([
            row(jnp.concatenate([p["bq"], p["bk"], p["bv"]], axis=1)),
            row(p["bo"]), row(p["b1"]), row(p["b2"]),
            row(p["ln1_g"]), row(p["ln1_b"]), row(p["ln2_g"]), row(p["ln2_b"]),
        ], axis=0)                                                          # (8, 96) f32
        bias_list.append(bias_rows)
    return jnp.stack(wa_list), jnp.stack(wb_list), jnp.stack(bias_list)


if __name__ == "__main__":
    key = jax.random.PRNGKey(0)
    k_x, k_p = jax.random.split(key)

    hidden_states = jax.random.normal(k_x, (BATCH, SEQ, D_EMBD), jnp.float32)
    # mask: last 2 positions of each sequence are padding
    attention_mask = jnp.concatenate(
        [jnp.ones((BATCH, SEQ - 2), jnp.float32), jnp.zeros((BATCH, 2), jnp.float32)],
        axis=-1,
    )

    block_keys = jax.random.split(k_p, N_BLOCK)
    blocks_params = [init_block_params(bk) for bk in block_keys]
    wa, wb, bias_slab = pack_block_params(blocks_params)

    out = encoder_forward(hidden_states, attention_mask, wa, wb, bias_slab)
    out = jax.block_until_ready(out)

    assert out.shape == (BATCH, SEQ, D_EMBD)
    assert jnp.all(jnp.isfinite(out))
    print("KERNEL_OK")
</pallas_src>

<mosaic_0001>
module attributes {stable_mosaic.version = 11 : i64} {
  func.func @encoder_kernel(%arg0: i32, %arg1: memref<16x32xf32, #tpu.memory_space<vmem>>, %arg2: memref<64x16xf32, #tpu.memory_space<vmem>>, %arg3: memref<4x32xf32, #tpu.memory_space<vmem>>, %arg4: memref<2x32x192xbf16, #tpu.memory_space<vmem>>, %arg5: memref<2x64x32xbf16, #tpu.memory_space<vmem>>, %arg6: memref<2x8x96xf32, #tpu.memory_space<vmem>>, %arg7: memref<16x32xf32, #tpu.memory_space<vmem>>) attributes {dimension_semantics = [#tpu.dimension_semantics<arbitrary>], iteration_bounds = array<i64: 1>, scalar_prefetch = 0 : i64, scratch_operands = 0 : i64, tpu.core_type = #tpu.core_type<tc>, window_params = [{pipeline_mode = #tpu.pipeline_mode<synchronous>, transform_indices = @transform_0, window_bounds = array<i64: 16, 32>}, {pipeline_mode = #tpu.pipeline_mode<synchronous>, transform_indices = @transform_1, window_bounds = array<i64: 64, 16>}, {pipeline_mode = #tpu.pipeline_mode<synchronous>, transform_indices = @transform_2, window_bounds = array<i64: 4, 32>}, {pipeline_mode = #tpu.pipeline_mode<synchronous>, transform_indices = @transform_3, window_bounds = array<i64: 2, 32, 192>}, {pipeline_mode = #tpu.pipeline_mode<synchronous>, transform_indices = @transform_4, window_bounds = array<i64: 2, 64, 32>}, {pipeline_mode = #tpu.pipeline_mode<synchronous>, transform_indices = @transform_5, window_bounds = array<i64: 2, 8, 96>}, {pipeline_mode = #tpu.pipeline_mode<synchronous>, transform_indices = @transform_6, window_bounds = array<i64: 16, 32>}]} {
    %c0 = arith.constant 0 : index
    %c0_0 = arith.constant 0 : index
    %0 = vector.load %arg1[%c0, %c0_0] : memref<16x32xf32, #tpu.memory_space<vmem>>, vector<16x32xf32>
    %c0_1 = arith.constant 0 : index
    %c0_2 = arith.constant 0 : index
    %1 = vector.load %arg2[%c0_1, %c0_2] : memref<64x16xf32, #tpu.memory_space<vmem>>, vector<64x16xf32>
    %c0_3 = arith.constant 0 : index
    %c0_4 = arith.constant 0 : index
    %2 = vector.load %arg3[%c0_3, %c0_4] : memref<4x32xf32, #tpu.memory_space<vmem>>, vector<4x32xf32>
    %c0_5 = arith.constant 0 : index
    %c0_6 = arith.constant 0 : index
    %c0_7 = arith.constant 0 : index
    %3 = vector.load %arg4[%c0_5, %c0_6, %c0_7] : memref<2x32x192xbf16, #tpu.memory_space<vmem>>, vector<1x32x192xbf16>
    %4 = vector.shape_cast %3 : vector<1x32x192xbf16> to vector<32x192xbf16>
    %c0_8 = arith.constant 0 : index
    %c0_9 = arith.constant 0 : index
    %c0_10 = arith.constant 0 : index
    %5 = vector.load %arg5[%c0_8, %c0_9, %c0_10] : memref<2x64x32xbf16, #tpu.memory_space<vmem>>, vector<1x64x32xbf16>
    %6 = vector.shape_cast %5 : vector<1x64x32xbf16> to vector<64x32xbf16>
    %c0_11 = arith.constant 0 : index
    %c0_12 = arith.constant 0 : index
    %c0_13 = arith.constant 0 : index
    %7 = vector.load %arg6[%c0_11, %c0_12, %c0_13] : memref<2x8x96xf32, #tpu.memory_space<vmem>>, vector<1x8x96xf32>
    %8 = vector.shape_cast %7 : vector<1x8x96xf32> to vector<8x96xf32>
    %9 = vector.extract_strided_slice %4 {offsets = [0, 0], sizes = [32, 96], strides = [1, 1]} : vector<32x192xbf16> to vector<32x96xbf16>
    %10 = vector.extract_strided_slice %4 {offsets = [0, 96], sizes = [32, 32], strides = [1, 1]} : vector<32x192xbf16> to vector<32x32xbf16>
    %11 = vector.extract_strided_slice %4 {offsets = [0, 128], sizes = [32, 64], strides = [1, 1]} : vector<32x192xbf16> to vector<32x64xbf16>
    %12 = vector.extract_strided_slice %8 {offsets = [0, 0], sizes = [1, 96], strides = [1, 1]} : vector<8x96xf32> to vector<1x96xf32>
    %13 = vector.extract_strided_slice %8 {offsets = [1, 0], sizes = [1, 32], strides = [1, 1]} : vector<8x96xf32> to vector<1x32xf32>
    %14 = vector.extract_strided_slice %8 {offsets = [2, 0], sizes = [1, 64], strides = [1, 1]} : vector<8x96xf32> to vector<1x64xf32>
    %15 = vector.extract_strided_slice %8 {offsets = [3, 0], sizes = [1, 32], strides = [1, 1]} : vector<8x96xf32> to vector<1x32xf32>
    %16 = vector.extract_strided_slice %8 {offsets = [4, 0], sizes = [1, 32], strides = [1, 1]} : vector<8x96xf32> to vector<1x32xf32>
    %17 = vector.extract_strided_slice %8 {offsets = [5, 0], sizes = [1, 32], strides = [1, 1]} : vector<8x96xf32> to vector<1x32xf32>
    %18 = vector.extract_strided_slice %8 {offsets = [6, 0], sizes = [1, 32], strides = [1, 1]} : vector<8x96xf32> to vector<1x32xf32>
    %19 = vector.extract_strided_slice %8 {offsets = [7, 0], sizes = [1, 32], strides = [1, 1]} : vector<8x96xf32> to vector<1x32xf32>
    %20 = arith.truncf %0 : vector<16x32xf32> to vector<16x32xbf16>
    %cst = arith.constant dense<0.000000e+00> : vector<16x96xf32>
    %21 = tpu.matmul %20, %9, %cst {dimension_numbers = #tpu.dot_dimension_numbers<[1], [0], [0], [1], [0, 0, 1, 1], [], []>} : vector<16x32xbf16>, vector<32x96xbf16>, vector<16x96xf32> -> vector<16x96xf32>
    %22 = vector.broadcast %12 : vector<1x96xf32> to vector<16x96xf32>
    %23 = arith.addf %21, %22 : vector<16x96xf32>
    %24 = vector.extract_strided_slice %23 {offsets = [0, 0], sizes = [16, 32], strides = [1, 1]} : vector<16x96xf32> to vector<16x32xf32>
    %25 = vector.extract_strided_slice %23 {offsets = [0, 32], sizes = [16, 32], strides = [1, 1]} : vector<16x96xf32> to vector<16x32xf32>
    %26 = vector.extract_strided_slice %23 {offsets = [0, 64], sizes = [16, 32], strides = [1, 1]} : vector<16x96xf32> to vector<16x32xf32>
    %27 = vector.shape_cast %24 : vector<16x32xf32> to vector<1x16x32xf32>
    %28 = vector.shape_cast %2 : vector<4x32xf32> to vector<4x1x32xf32>
    %29 = vector.broadcast %27 : vector<1x16x32xf32> to vector<4x16x32xf32>
    %30 = vector.broadcast %28 : vector<4x1x32xf32> to vector<4x16x32xf32>
    %31 = arith.mulf %29, %30 : vector<4x16x32xf32>
    %32 = vector.shape_cast %31 : vector<4x16x32xf32> to vector<64x32xf32>
    %33 = arith.truncf %32 : vector<64x32xf32> to vector<64x32xbf16>
    %34 = arith.truncf %25 : vector<16x32xf32> to vector<16x32xbf16>
    %cst_14 = arith.constant dense<0.000000e+00> : vector<64x16xf32>
    %35 = tpu.matmul %33, %34, %cst_14 {dimension_numbers = #tpu.dot_dimension_numbers<[1], [1], [0], [0], [0, 0, 1, 0], [], []>} : vector<64x32xbf16>, vector<16x32xbf16>, vector<64x16xf32> -> vector<64x16xf32>
    %cst_15 = arith.constant 0.353553385 : f32
    %36 = vector.broadcast %cst_15 : f32 to vector<64x16xf32>
    %37 = arith.mulf %35, %36 : vector<64x16xf32>
    %38 = arith.addf %37, %1 : vector<64x16xf32>
    %cst_16 = arith.constant dense<0xFF800000> : vector<64xf32>
    %39 = vector.multi_reduction <maximumf>, %38, %cst_16 [1] : vector<64x16xf32> to vector<64xf32>
    %40 = vector.shape_cast %39 : vector<64xf32> to vector<64x1xf32>
    %41 = vector.broadcast %40 : vector<64x1xf32> to vector<64x16xf32>
    %42 = arith.subf %38, %41 : vector<64x16xf32>
    %43 = math.exp %42 : vector<64x16xf32>
    %cst_17 = arith.constant dense<0.000000e+00> : vector<64xf32>
    %44 = vector.multi_reduction <add>, %43, %cst_17 [1] : vector<64x16xf32> to vector<64xf32>
    %45 = vector.shape_cast %44 : vector<64xf32> to vector<64x1xf32>
    %46 = tpu.reciprocal %45 {approx = true} : vector<64x1xf32> -> vector<64x1xf32>
    %47 = vector.broadcast %46 : vector<64x1xf32> to vector<64x16xf32>
    %48 = arith.mulf %43, %47 : vector<64x16xf32>
    %49 = arith.truncf %48 : vector<64x16xf32> to vector<64x16xbf16>
    %50 = arith.truncf %26 : vector<16x32xf32> to vector<16x32xbf16>
    %cst_18 = arith.constant dense<0.000000e+00> : vector<64x32xf32>
    %51 = tpu.matmul %49, %50, %cst_18 {dimension_numbers = #tpu.dot_dimension_numbers<[1], [0], [0], [1], [0, 0, 1, 1], [], []>} : vector<64x16xbf16>, vector<16x32xbf16>, vector<64x32xf32> -> vector<64x32xf32>
    %52 = vector.shape_cast %51 : vector<64x32xf32> to vector<4x16x32xf32>
    %53 = vector.shape_cast %2 : vector<4x32xf32> to vector<4x1x32xf32>
    %54 = vector.broadcast %53 : vector<4x1x32xf32> to vector<4x16x32xf32>
    %55 = arith.mulf %52, %54 : vector<4x16x32xf32>
    %cst_19 = arith.constant dense<0.000000e+00> : vector<16x32xf32>
    %56 = vector.multi_reduction <add>, %55, %cst_19 [0] : vector<4x16x32xf32> to vector<16x32xf32>
    %57 = arith.truncf %56 : vector<16x32xf32> to vector<16x32xbf16>
    %cst_20 = arith.constant dense<0.000000e+00> : vector<16x32xf32>
    %58 = tpu.matmul %57, %10, %cst_20 {dimension_numbers = #tpu.dot_dimension_numbers<[1], [0], [0], [1], [0, 0, 1, 1], [], []>} : vector<16x32xbf16>, vector<32x32xbf16>, vector<16x32xf32> -> vector<16x32xf32>
    %59 = vector.broadcast %13 : vector<1x32xf32> to vector<16x32xf32>
    %60 = arith.addf %58, %59 : vector<16x32xf32>
    %61 = arith.addf %0, %60 : vector<16x32xf32>
    %cst_21 = arith.constant dense<0.000000e+00> : vector<16xf32>
    %62 = vector.multi_reduction <add>, %61, %cst_21 [1] : vector<16x32xf32> to vector<16xf32>
    %63 = vector.shape_cast %62 : vector<16xf32> to vector<16x1xf32>
    %cst_22 = arith.constant 3.200000e+01 : f32
    %64 = vector.broadcast %cst_22 : f32 to vector<16x1xf32>
    %65 = arith.divf %63, %64 : vector<16x1xf32>
    %66 = vector.broadcast %65 : vector<16x1xf32> to vector<16x32xf32>
    %67 = arith.subf %61, %66 : vector<16x32xf32>
    %68 = arith.mulf %67, %67 : vector<16x32xf32>
    %cst_23 = arith.constant dense<0.000000e+00> : vector<16xf32>
    %69 = vector.multi_reduction <add>, %68, %cst_23 [1] : vector<16x32xf32> to vector<16xf32>
    %70 = vector.shape_cast %69 : vector<16xf32> to vector<16x1xf32>
    %cst_24 = arith.constant 3.200000e+01 : f32
    %71 = vector.broadcast %cst_24 : f32 to vector<16x1xf32>
    %72 = arith.divf %70, %71 : vector<16x1xf32>
    %cst_25 = arith.constant 9.99999974E-6 : f32
    %73 = vector.broadcast %cst_25 : f32 to vector<16x1xf32>
    %74 = arith.addf %72, %73 : vector<16x1xf32>
    %75 = math.rsqrt %74 : vector<16x1xf32>
    %76 = vector.broadcast %75 : vector<16x1xf32> to vector<16x32xf32>
    %77 = arith.mulf %67, %76 : vector<16x32xf32>
    %78 = vector.broadcast %16 : vector<1x32xf32> to vector<16x32xf32>
    %79 = arith.mulf %77, %78 : vector<16x32xf32>
    %80 = vector.broadcast %17 : vector<1x32xf32> to vector<16x32xf32>
    %81 = arith.addf %79, %80 : vector<16x32xf32>
    %82 = arith.truncf %81 : vector<16x32xf32> to vector<16x32xbf16>
    %cst_26 = arith.constant dense<0.000000e+00> : vector<16x64xf32>
    %83 = tpu.matmul %82, %11, %cst_26 {dimension_numbers = #tpu.dot_dimension_numbers<[1], [0], [0], [1], [0, 0, 1, 1], [], []>} : vector<16x32xbf16>, vector<32x64xbf16>, vector<16x64xf32> -> vector<16x64xf32>
    %84 = vector.broadcast %14 : vector<1x64xf32> to vector<16x64xf32>
    %85 = arith.addf %83, %84 : vector<16x64xf32>
    %cst_27 = arith.constant 5.000000e-01 : f32
    %86 = vector.broadcast %cst_27 : f32 to vector<16x64xf32>
    %87 = arith.mulf %86, %85 : vector<16x64xf32>
    %cst_28 = arith.constant 4.471500e-02 : f32
    %88 = vector.broadcast %cst_28 : f32 to vector<16x64xf32>
    %89 = arith.mulf %88, %85 : vector<16x64xf32>
    %90 = arith.mulf %89, %85 : vector<16x64xf32>
    %91 = arith.mulf %90, %85 : vector<16x64xf32>
    %92 = arith.addf %85, %91 : vector<16x64xf32>
    %cst_29 = arith.constant 0.797884583 : f32
    %93 = vector.broadcast %cst_29 : f32 to vector<16x64xf32>
    %94 = arith.mulf %93, %92 : vector<16x64xf32>
    %95 = math.tanh %94 : vector<16x64xf32>
    %cst_30 = arith.constant 1.000000e+00 : f32
    %96 = vector.broadcast %cst_30 : f32 to vector<16x64xf32>
    %97 = arith.addf %96, %95 : vector<16x64xf32>
    %98 = arith.mulf %87, %97 : vector<16x64xf32>
    %99 = arith.truncf %98 : vector<16x64xf32> to vector<16x64xbf16>
    %cst_31 = arith.constant dense<0.000000e+00> : vector<16x32xf32>
    %100 = tpu.matmul %99, %6, %cst_31 {dimension_numbers = #tpu.dot_dimension_numbers<[1], [0], [0], [1], [0, 0, 1, 1], [], []>} : vector<16x64xbf16>, vector<64x32xbf16>, vector<16x32xf32> -> vector<16x32xf32>
    %101 = vector.broadcast %15 : vector<1x32xf32> to vector<16x32xf32>
    %102 = arith.addf %100, %101 : vector<16x32xf32>
    %103 = arith.addf %81, %102 : vector<16x32xf32>
    %cst_32 = arith.constant dense<0.000000e+00> : vector<16xf32>
    %104 = vector.multi_reduction <add>, %103, %cst_32 [1] : vector<16x32xf32> to vector<16xf32>
    %105 = vector.shape_cast %104 : vector<16xf32> to vector<16x1xf32>
    %cst_33 = arith.constant 3.200000e+01 : f32
    %106 = vector.broadcast %cst_33 : f32 to vector<16x1xf32>
    %107 = arith.divf %105, %106 : vector<16x1xf32>
    %108 = vector.broadcast %107 : vector<16x1xf32> to vector<16x32xf32>
    %109 = arith.subf %103, %108 : vector<16x32xf32>
    %110 = arith.mulf %109, %109 : vector<16x32xf32>
    %cst_34 = arith.constant dense<0.000000e+00> : vector<16xf32>
    %111 = vector.multi_reduction <add>, %110, %cst_34 [1] : vector<16x32xf32> to vector<16xf32>
    %112 = vector.shape_cast %111 : vector<16xf32> to vector<16x1xf32>
    %cst_35 = arith.constant 3.200000e+01 : f32
    %113 = vector.broadcast %cst_35 : f32 to vector<16x1xf32>
    %114 = arith.divf %112, %113 : vector<16x1xf32>
    %cst_36 = arith.constant 9.99999974E-6 : f32
    %115 = vector.broadcast %cst_36 : f32 to vector<16x1xf32>
    %116 = arith.addf %114, %115 : vector<16x1xf32>
    %117 = math.rsqrt %116 : vector<16x1xf32>
    %118 = vector.broadcast %117 : vector<16x1xf32> to vector<16x32xf32>
    %119 = arith.mulf %109, %118 : vector<16x32xf32>
    %120 = vector.broadcast %18 : vector<1x32xf32> to vector<16x32xf32>
    %121 = arith.mulf %119, %120 : vector<16x32xf32>
    %122 = vector.broadcast %19 : vector<1x32xf32> to vector<16x32xf32>
    %123 = arith.addf %121, %122 : vector<16x32xf32>
    %c1 = arith.constant 1 : index
    %c0_37 = arith.constant 0 : index
    %c0_38 = arith.constant 0 : index
    %124 = vector.load %arg4[%c1, %c0_37, %c0_38] : memref<2x32x192xbf16, #tpu.memory_space<vmem>>, vector<1x32x192xbf16>
    %125 = vector.shape_cast %124 : vector<1x32x192xbf16> to vector<32x192xbf16>
    %c1_39 = arith.constant 1 : index
    %c0_40 = arith.constant 0 : index
    %c0_41 = arith.constant 0 : index
    %126 = vector.load %arg5[%c1_39, %c0_40, %c0_41] : memref<2x64x32xbf16, #tpu.memory_space<vmem>>, vector<1x64x32xbf16>
    %127 = vector.shape_cast %126 : vector<1x64x32xbf16> to vector<64x32xbf16>
    %c1_42 = arith.constant 1 : index
    %c0_43 = arith.constant 0 : index
    %c0_44 = arith.constant 0 : index
    %128 = vector.load %arg6[%c1_42, %c0_43, %c0_44] : memref<2x8x96xf32, #tpu.memory_space<vmem>>, vector<1x8x96xf32>
    %129 = vector.shape_cast %128 : vector<1x8x96xf32> to vector<8x96xf32>
    %130 = vector.extract_strided_slice %125 {offsets = [0, 0], sizes = [32, 96], strides = [1, 1]} : vector<32x192xbf16> to vector<32x96xbf16>
    %131 = vector.extract_strided_slice %125 {offsets = [0, 96], sizes = [32, 32], strides = [1, 1]} : vector<32x192xbf16> to vector<32x32xbf16>
    %132 = vector.extract_strided_slice %125 {offsets = [0, 128], sizes = [32, 64], strides = [1, 1]} : vector<32x192xbf16> to vector<32x64xbf16>
    %133 = vector.extract_strided_slice %129 {offsets = [0, 0], sizes = [1, 96], strides = [1, 1]} : vector<8x96xf32> to vector<1x96xf32>
    %134 = vector.extract_strided_slice %129 {offsets = [1, 0], sizes = [1, 32], strides = [1, 1]} : vector<8x96xf32> to vector<1x32xf32>
    %135 = vector.extract_strided_slice %129 {offsets = [2, 0], sizes = [1, 64], strides = [1, 1]} : vector<8x96xf32> to vector<1x64xf32>
    %136 = vector.extract_strided_slice %129 {offsets = [3, 0], sizes = [1, 32], strides = [1, 1]} : vector<8x96xf32> to vector<1x32xf32>
    %137 = vector.extract_strided_slice %129 {offsets = [4, 0], sizes = [1, 32], strides = [1, 1]} : vector<8x96xf32> to vector<1x32xf32>
    %138 = vector.extract_strided_slice %129 {offsets = [5, 0], sizes = [1, 32], strides = [1, 1]} : vector<8x96xf32> to vector<1x32xf32>
    %139 = vector.extract_strided_slice %129 {offsets = [6, 0], sizes = [1, 32], strides = [1, 1]} : vector<8x96xf32> to vector<1x32xf32>
    %140 = vector.extract_strided_slice %129 {offsets = [7, 0], sizes = [1, 32], strides = [1, 1]} : vector<8x96xf32> to vector<1x32xf32>
    %141 = arith.truncf %123 : vector<16x32xf32> to vector<16x32xbf16>
    %cst_45 = arith.constant dense<0.000000e+00> : vector<16x96xf32>
    %142 = tpu.matmul %141, %130, %cst_45 {dimension_numbers = #tpu.dot_dimension_numbers<[1], [0], [0], [1], [0, 0, 1, 1], [], []>} : vector<16x32xbf16>, vector<32x96xbf16>, vector<16x96xf32> -> vector<16x96xf32>
    %143 = vector.broadcast %133 : vector<1x96xf32> to vector<16x96xf32>
    %144 = arith.addf %142, %143 : vector<16x96xf32>
    %145 = vector.extract_strided_slice %144 {offsets = [0, 0], sizes = [16, 32], strides = [1, 1]} : vector<16x96xf32> to vector<16x32xf32>
    %146 = vector.extract_strided_slice %144 {offsets = [0, 32], sizes = [16, 32], strides = [1, 1]} : vector<16x96xf32> to vector<16x32xf32>
    %147 = vector.extract_strided_slice %144 {offsets = [0, 64], sizes = [16, 32], strides = [1, 1]} : vector<16x96xf32> to vector<16x32xf32>
    %148 = vector.shape_cast %145 : vector<16x32xf32> to vector<1x16x32xf32>
    %149 = vector.shape_cast %2 : vector<4x32xf32> to vector<4x1x32xf32>
    %150 = vector.broadcast %148 : vector<1x16x32xf32> to vector<4x16x32xf32>
    %151 = vector.broadcast %149 : vector<4x1x32xf32> to vector<4x16x32xf32>
    %152 = arith.mulf %150, %151 : vector<4x16x32xf32>
    %153 = vector.shape_cast %152 : vector<4x16x32xf32> to vector<64x32xf32>
    %154 = arith.truncf %153 : vector<64x32xf32> to vector<64x32xbf16>
    %155 = arith.truncf %146 : vector<16x32xf32> to vector<16x32xbf16>
    %cst_46 = arith.constant dense<0.000000e+00> : vector<64x16xf32>
    %156 = tpu.matmul %154, %155, %cst_46 {dimension_numbers = #tpu.dot_dimension_numbers<[1], [1], [0], [0], [0, 0, 1, 0], [], []>} : vector<64x32xbf16>, vector<16x32xbf16>, vector<64x16xf32> -> vector<64x16xf32>
    %cst_47 = arith.constant 0.353553385 : f32
    %157 = vector.broadcast %cst_47 : f32 to vector<64x16xf32>
    %158 = arith.mulf %156, %157 : vector<64x16xf32>
    %159 = arith.addf %158, %1 : vector<64x16xf32>
    %cst_48 = arith.constant dense<0xFF800000> : vector<64xf32>
    %160 = vector.multi_reduction <maximumf>, %159, %cst_48 [1] : vector<64x16xf32> to vector<64xf32>
    %161 = vector.shape_cast %160 : vector<64xf32> to vector<64x1xf32>
    %162 = vector.broadcast %161 : vector<64x1xf32> to vector<64x16xf32>
    %163 = arith.subf %159, %162 : vector<64x16xf32>
    %164 = math.exp %163 : vector<64x16xf32>
    %cst_49 = arith.constant dense<0.000000e+00> : vector<64xf32>
    %165 = vector.multi_reduction <add>, %164, %cst_49 [1] : vector<64x16xf32> to vector<64xf32>
    %166 = vector.shape_cast %165 : vector<64xf32> to vector<64x1xf32>
    %167 = tpu.reciprocal %166 {approx = true} : vector<64x1xf32> -> vector<64x1xf32>
    %168 = vector.broadcast %167 : vector<64x1xf32> to vector<64x16xf32>
    %169 = arith.mulf %164, %168 : vector<64x16xf32>
    %170 = arith.truncf %169 : vector<64x16xf32> to vector<64x16xbf16>
    %171 = arith.truncf %147 : vector<16x32xf32> to vector<16x32xbf16>
    %cst_50 = arith.constant dense<0.000000e+00> : vector<64x32xf32>
    %172 = tpu.matmul %170, %171, %cst_50 {dimension_numbers = #tpu.dot_dimension_numbers<[1], [0], [0], [1], [0, 0, 1, 1], [], []>} : vector<64x16xbf16>, vector<16x32xbf16>, vector<64x32xf32> -> vector<64x32xf32>
    %173 = vector.shape_cast %172 : vector<64x32xf32> to vector<4x16x32xf32>
    %174 = vector.shape_cast %2 : vector<4x32xf32> to vector<4x1x32xf32>
    %175 = vector.broadcast %174 : vector<4x1x32xf32> to vector<4x16x32xf32>
    %176 = arith.mulf %173, %175 : vector<4x16x32xf32>
    %cst_51 = arith.constant dense<0.000000e+00> : vector<16x32xf32>
    %177 = vector.multi_reduction <add>, %176, %cst_51 [0] : vector<4x16x32xf32> to vector<16x32xf32>
    %178 = arith.truncf %177 : vector<16x32xf32> to vector<16x32xbf16>
    %cst_52 = arith.constant dense<0.000000e+00> : vector<16x32xf32>
    %179 = tpu.matmul %178, %131, %cst_52 {dimension_numbers = #tpu.dot_dimension_numbers<[1], [0], [0], [1], [0, 0, 1, 1], [], []>} : vector<16x32xbf16>, vector<32x32xbf16>, vector<16x32xf32> -> vector<16x32xf32>
    %180 = vector.broadcast %134 : vector<1x32xf32> to vector<16x32xf32>
    %181 = arith.addf %179, %180 : vector<16x32xf32>
    %182 = arith.addf %123, %181 : vector<16x32xf32>
    %cst_53 = arith.constant dense<0.000000e+00> : vector<16xf32>
    %183 = vector.multi_reduction <add>, %182, %cst_53 [1] : vector<16x32xf32> to vector<16xf32>
    %184 = vector.shape_cast %183 : vector<16xf32> to vector<16x1xf32>
    %cst_54 = arith.constant 3.200000e+01 : f32
    %185 = vector.broadcast %cst_54 : f32 to vector<16x1xf32>
    %186 = arith.divf %184, %185 : vector<16x1xf32>
    %187 = vector.broadcast %186 : vector<16x1xf32> to vector<16x32xf32>
    %188 = arith.subf %182, %187 : vector<16x32xf32>
    %189 = arith.mulf %188, %188 : vector<16x32xf32>
    %cst_55 = arith.constant dense<0.000000e+00> : vector<16xf32>
    %190 = vector.multi_reduction <add>, %189, %cst_55 [1] : vector<16x32xf32> to vector<16xf32>
    %191 = vector.shape_cast %190 : vector<16xf32> to vector<16x1xf32>
    %cst_56 = arith.constant 3.200000e+01 : f32
    %192 = vector.broadcast %cst_56 : f32 to vector<16x1xf32>
    %193 = arith.divf %191, %192 : vector<16x1xf32>
    %cst_57 = arith.constant 9.99999974E-6 : f32
    %194 = vector.broadcast %cst_57 : f32 to vector<16x1xf32>
    %195 = arith.addf %193, %194 : vector<16x1xf32>
    %196 = math.rsqrt %195 : vector<16x1xf32>
    %197 = vector.broadcast %196 : vector<16x1xf32> to vector<16x32xf32>
    %198 = arith.mulf %188, %197 : vector<16x32xf32>
    %199 = vector.broadcast %137 : vector<1x32xf32> to vector<16x32xf32>
    %200 = arith.mulf %198, %199 : vector<16x32xf32>
    %201 = vector.broadcast %138 : vector<1x32xf32> to vector<16x32xf32>
    %202 = arith.addf %200, %201 : vector<16x32xf32>
    %203 = arith.truncf %202 : vector<16x32xf32> to vector<16x32xbf16>
    %cst_58 = arith.constant dense<0.000000e+00> : vector<16x64xf32>
    %204 = tpu.matmul %203, %132, %cst_58 {dimension_numbers = #tpu.dot_dimension_numbers<[1], [0], [0], [1], [0, 0, 1, 1], [], []>} : vector<16x32xbf16>, vector<32x64xbf16>, vector<16x64xf32> -> vector<16x64xf32>
    %205 = vector.broadcast %135 : vector<1x64xf32> to vector<16x64xf32>
    %206 = arith.addf %204, %205 : vector<16x64xf32>
    %cst_59 = arith.constant 5.000000e-01 : f32
    %207 = vector.broadcast %cst_59 : f32 to vector<16x64xf32>
    %208 = arith.mulf %207, %206 : vector<16x64xf32>
    %cst_60 = arith.constant 4.471500e-02 : f32
    %209 = vector.broadcast %cst_60 : f32 to vector<16x64xf32>
    %210 = arith.mulf %209, %206 : vector<16x64xf32>
    %211 = arith.mulf %210, %206 : vector<16x64xf32>
    %212 = arith.mulf %211, %206 : vector<16x64xf32>
    %213 = arith.addf %206, %212 : vector<16x64xf32>
    %cst_61 = arith.constant 0.797884583 : f32
    %214 = vector.broadcast %cst_61 : f32 to vector<16x64xf32>
    %215 = arith.mulf %214, %213 : vector<16x64xf32>
    %216 = math.tanh %215 : vector<16x64xf32>
    %cst_62 = arith.constant 1.000000e+00 : f32
    %217 = vector.broadcast %cst_62 : f32 to vector<16x64xf32>
    %218 = arith.addf %217, %216 : vector<16x64xf32>
    %219 = arith.mulf %208, %218 : vector<16x64xf32>
    %220 = arith.truncf %219 : vector<16x64xf32> to vector<16x64xbf16>
    %cst_63 = arith.constant dense<0.000000e+00> : vector<16x32xf32>
    %221 = tpu.matmul %220, %127, %cst_63 {dimension_numbers = #tpu.dot_dimension_numbers<[1], [0], [0], [1], [0, 0, 1, 1], [], []>} : vector<16x64xbf16>, vector<64x32xbf16>, vector<16x32xf32> -> vector<16x32xf32>
    %222 = vector.broadcast %136 : vector<1x32xf32> to vector<16x32xf32>
    %223 = arith.addf %221, %222 : vector<16x32xf32>
    %224 = arith.addf %202, %223 : vector<16x32xf32>
    %cst_64 = arith.constant dense<0.000000e+00> : vector<16xf32>
    %225 = vector.multi_reduction <add>, %224, %cst_64 [1] : vector<16x32xf32> to vector<16xf32>
    %226 = vector.shape_cast %225 : vector<16xf32> to vector<16x1xf32>
    %cst_65 = arith.constant 3.200000e+01 : f32
    %227 = vector.broadcast %cst_65 : f32 to vector<16x1xf32>
    %228 = arith.divf %226, %227 : vector<16x1xf32>
    %229 = vector.broadcast %228 : vector<16x1xf32> to vector<16x32xf32>
    %230 = arith.subf %224, %229 : vector<16x32xf32>
    %231 = arith.mulf %230, %230 : vector<16x32xf32>
    %cst_66 = arith.constant dense<0.000000e+00> : vector<16xf32>
    %232 = vector.multi_reduction <add>, %231, %cst_66 [1] : vector<16x32xf32> to vector<16xf32>
    %233 = vector.shape_cast %232 : vector<16xf32> to vector<16x1xf32>
    %cst_67 = arith.constant 3.200000e+01 : f32
    %234 = vector.broadcast %cst_67 : f32 to vector<16x1xf32>
    %235 = arith.divf %233, %234 : vector<16x1xf32>
    %cst_68 = arith.constant 9.99999974E-6 : f32
    %236 = vector.broadcast %cst_68 : f32 to vector<16x1xf32>
    %237 = arith.addf %235, %236 : vector<16x1xf32>
    %238 = math.rsqrt %237 : vector<16x1xf32>
    %239 = vector.broadcast %238 : vector<16x1xf32> to vector<16x32xf32>
    %240 = arith.mulf %230, %239 : vector<16x32xf32>
    %241 = vector.broadcast %139 : vector<1x32xf32> to vector<16x32xf32>
    %242 = arith.mulf %240, %241 : vector<16x32xf32>
    %243 = vector.broadcast %140 : vector<1x32xf32> to vector<16x32xf32>
    %244 = arith.addf %242, %243 : vector<16x32xf32>
    %c0_69 = arith.constant 0 : index
    %c0_70 = arith.constant 0 : index
    %245 = vector.load %arg7[%c0_69, %c0_70] : memref<16x32xf32, #tpu.memory_space<vmem>>, vector<16x32xf32>
    tpu.vector_store %arg7[%c0_69, %c0_70], %244 {strides = array<i32>} : memref<16x32xf32, #tpu.memory_space<vmem>>, vector<16x32xf32>,
    return
  }
  func.func @transform_0(%arg0: i32) -> (i32, i32) {
    %c0_i32 = arith.constant 0 : i32
    %c0_i32_0 = arith.constant 0 : i32
    %c0_i32_1 = arith.constant 0 : i32
    return %c0_i32, %c0_i32_0 : i32, i32
  }
  func.func @transform_1(%arg0: i32) -> (i32, i32) {
    %c0_i32 = arith.constant 0 : i32
    %c0_i32_0 = arith.constant 0 : i32
    %c0_i32_1 = arith.constant 0 : i32
    return %c0_i32, %c0_i32_0 : i32, i32
  }
  func.func @transform_2(%arg0: i32) -> (i32, i32) {
    %c0_i32 = arith.constant 0 : i32
    %c0_i32_0 = arith.constant 0 : i32
    %c0_i32_1 = arith.constant 0 : i32
    return %c0_i32, %c0_i32_0 : i32, i32
  }
  func.func @transform_3(%arg0: i32) -> (i32, i32, i32) {
    %c0_i32 = arith.constant 0 : i32
    %c0_i32_0 = arith.constant 0 : i32
    %c0_i32_1 = arith.constant 0 : i32
    %c0_i32_2 = arith.constant 0 : i32
    return %c0_i32, %c0_i32_0, %c0_i32_1 : i32, i32, i32
  }
  func.func @transform_4(%arg0: i32) -> (i32, i32, i32) {
    %c0_i32 = arith.constant 0 : i32
    %c0_i32_0 = arith.constant 0 : i32
    %c0_i32_1 = arith.constant 0 : i32
    %c0_i32_2 = arith.constant 0 : i32
    return %c0_i32, %c0_i32_0, %c0_i32_1 : i32, i32, i32
  }
  func.func @transform_5(%arg0: i32) -> (i32, i32, i32) {
    %c0_i32 = arith.constant 0 : i32
    %c0_i32_0 = arith.constant 0 : i32
    %c0_i32_1 = arith.constant 0 : i32
    %c0_i32_2 = arith.constant 0 : i32
    return %c0_i32, %c0_i32_0, %c0_i32_1 : i32, i32, i32
  }
  func.func @transform_6(%arg0: i32) -> (i32, i32) {
    %c0_i32 = arith.constant 0 : i32
    %c0_i32_0 = arith.constant 0 : i32
    %c0_i32_1 = arith.constant 0 : i32
    return %c0_i32, %c0_i32_0 : i32, i32
  }
}

</mosaic_0001>

<bundles_post_ra>
// kernel: tpu_custom_call.1
= control target key start
LH: loop header
LB: loop body
LE: loop exit
PB: predicated region body
PF: predicated region fallthrough
CT: control target
= control target key end

     0   :  { %v1789_v1 = vmov 0.0   ;;  %vm1790_vm0 = vmmov 0   ;;  %vm66_vm1 = vcmask 261120   ;;  %s2261_s0 = inlined_call_operand.vmem [shape: f32[16,32], index: 0, kind: input, shape index: {}]   ;;  %s2262_s1 = inlined_call_operand.vmem [shape: f32[64,16], index: 1, kind: input, shape index: {}]   ;;  %s2263_s2 = inlined_call_operand.vmem [shape: f32[4,32], index: 2, kind: input, shape index: {}]   ;;  %s2264_s3 = inlined_call_operand.vmem [shape: bf16[2,32,192], index: 3, kind: input, shape index: {}]   ;;  %s2265_s4 = inlined_call_operand.vmem [shape: bf16[2,64,32], index: 4, kind: input, shape index: {}]   ;;  %s2266_s5 = inlined_call_operand.vmem [shape: f32[2,8,96], index: 5, kind: input, shape index: {}]   ;;  %s2267_s6 = inlined_call_operand.hbm [shape: f32[16,32], index: 6, kind: output, shape index: {}]  }
   0x1   :  { %v1836_v0 = vld [vmem:[%s2264_s3] ss:$8 sps:$4 sm:$0xff]   ;;  %1534 = vmatprep.subr.bf16.mxu1 %v1789_v1  ;;  %1538 = vmatprep.mubr.msk.bf16.mxu1 %vm1790_vm0, %v1789_v1  ;;  %v1845_v2 = vld [vmem:[%s2264_s3 + $0x10] ss:$8 sps:$4 sm:$0xff]  }
   0x2   :  { %1535 = vmatpush3.bf16.msra.mxu1 %v1836_v0  ;;  %v1850_v3 = vld [vmem:[%s2261_s0] sm:$0xff]  ;;  %v1856_v4 = vld [vmem:[%s2261_s0 + $0x8] sm:$0xff] }
   0x3   :  { %1536 = vmatprep.subr.bf16.mxu1 %v1789_v1  ;;  %v49_v5 = vpack.c.bf16 %v1856_v4, %v1850_v3 }
   0x6   :  { %1537 = vmatpush3.bf16.msra.mxu1 %v1845_v2 }
   0x9   :  { %1539 = vmatmul.mubr.msk.bf16.vlgmr.msra.gmra.mrb[0].mxu1 %vm66_vm1, %v49_v5 }
   0xa   :  { %11 = vsyncpa [#allocation3], 0  ;;  %v50_v6 = vlaneseq  ;;  %v1791_v8 = vmov 1966171168   ;;  %v1874_v17 = vld [vmem:[%s2266_s5] sm:$0xff]  ;;  %v1914_v47 = vld [vmem:[%s2262_s1 + $0x10] sm:$0xff] }
   0xb   :  { %v121_v9 = vunpack.c.l.s4 %v1791_v8  ;;  %v1435_v10 = vld.sshfl [vmem:[%s2263_s2] sm:$0x33 pattern:$0x75316420]  ;;  %s1792_s2 = smov 96   ;;  %vm268_vm2 = vcmask 130048  }
   0xc   :  { %v1862_v7 = vshrl.u32 %v50_v6, 7  ;;  %v119_v12 = vcombine.high %v1435_v10, %v1435_v10  ;;  %v1919_v50 = vld [vmem:[%s2262_s1] sm:$0xff]  ;;  %v1924_v53 = vld [vmem:[%s2262_s1 + $0x18] sm:$0xff]  ;;  %v1934_v62 = vld [vmem:[%s2262_s1 + $0x8] sm:$0xff]  ;;  %s1794_s24 = smov 32   ;;  %vm663_vm3 = vcmask 523264  }
   0xd   :  { %v122_v11 = vunpack.c.0.s8 %v121_v9 }
   0xe   :  { %v1869_v16 = vsub.s32 0, %v1862_v7 }
   0xf   :  { %v125_v13 = vsub.s32 %v122_v11, %v1862_v7  ;;  %v1941_v11 = vld [vmem:[%s2262_s1 + $0x30] sm:$0xff] }
  0x10   :  { %v53_v19 = vrot.slane %v1874_v17, %v1869_v16 }
  0x11   :  { %v133_v14 = vrot.slane %v119_v12, %v125_v13  ;;  %v126_v15 = vrot.slane %v1435_v10, %v125_v13 }
  0x13   :  { %v134_v18 = vcombine.high %v126_v15, %v126_v15  ;;  %v135_v20 = vcombine.high %v133_v14, %v133_v14  ;;  %v1879_v22 = vrot.slane %v126_v15, %v1869_v16  ;;  %v1882_v23 = vrot.slane %v133_v14, %v1869_v16 }
  0x15   :  { %v1885_v24 = vrot.slane %v134_v18, %v1869_v16  ;;  %v1888_v27 = vrot.slane %v135_v20, %v1869_v16  ;;  %v1948_v18 = vld [vmem:[%s2262_s1 + $0x20] sm:$0xff] }
  0xdc   :  { %v104_v21 = vpop.f32.mrb[0].mxu1 }
  0xdd   :  { %v105_v25 = vadd.f32 %v104_v21, %v53_v19  ;;  %v1540_v26 = vpop.f32.mrb[1].mxu1 }
  0xde   :  { %v107_v28 = vpop.f32.mrb[2].mxu1 }
  0xdf   :  { %v108_v29 = vadd.f32 %v107_v28, %v53_v19  ;;  %v1541_v30 = vpop.f32.mrb[3].mxu1  ;;  %v158_v31 = vmul.f32 %v1882_v23, %v105_v25  ;;  %v156_v32 = vmul.f32 %v1879_v22, %v105_v25  ;;  %v160_v33 = vmul.f32 %v1885_v24, %v105_v25 }
  0xe0   :  { %v162_v38 = vmul.f32 %v1888_v27, %v105_v25  ;;  %v1962_v30 = vld [vmem:[%s2262_s1 + $0x38] sm:$0xff] }
  0xe1   :  { %v159_v34 = vmul.f32 %v1882_v23, %v108_v29  ;;  %v1894_v35 = vpack.c.bf16 %v108_v29, %v105_v25  ;;  %v157_v36 = vmul.f32 %v1879_v22, %v108_v29  ;;  %v161_v37 = vmul.f32 %v1885_v24, %v108_v29  ;;  %v1955_v25 = vld [vmem:[%s2262_s1 + $0x28] sm:$0xff]  ;;  %s1793_s1 = smov 64  }
  0xe2   :  { %v163_v39 = vmul.f32 %v1888_v27, %v108_v29 }
  0xe3   :  { %170 = vrot.lane.b32.xlu0 %v1894_v35, %s1792_s2  ;;  %v164_v40 = vpack.c.bf16 %v157_v36, %v156_v32  ;;  %v165_v41 = vpack.c.bf16 %v159_v34, %v158_v31  ;;  %v166_v42 = vpack.c.bf16 %v161_v37, %v160_v33 }
  0xe4   :  { %v167_v43 = vpack.c.bf16 %v163_v39, %v162_v38 }
  0xe5   :  { %1544 = vmatprep.mubr.msk.bf16.mxu1 %vm66_vm1, %v164_v40 }
 0x155   :  { %v171_v44 = vpop.permute.xlu0 %170 }
 0x156   :  { %v185_v45 = vsel %vm66_vm1, %v171_v44, 0  ;;  %1646 = vmatprep.subr.msk.bf16.mxu1 %vm66_vm1, %v171_v44 }
 0x157   :  { %1543 = vmatpush3.bf16.xpose.msra.mxu1 %v185_v45 }
 0x158   :  { %1562 = vmatprep.subr.bf16.mxu1 %v1789_v1 }
 0x15e   :  { %1545 = vmatmul.mubr.msk.bf16.vlgmr.msra.gmra.mrb[4].mxu1 %vm66_vm1, %v165_v41 }
 0x15f   :  { %1548 = vmatprep.mubr.msk.bf16.mxu1 %vm66_vm1, %v166_v42 }
 0x166   :  { %1549 = vmatmul.mubr.msk.bf16.gmra.mrb[8].mxu1 %vm66_vm1, %v167_v43 }
 0x167   :  { %1566 = vmatprep.mubr.msk.bf16.mxu1 %vm1790_vm0, %v1789_v1 }
 0x231   :  { %v1546_v46 = vpop.f32.mrb[4].mxu1 }
 0x232   :  { %v254_v48 = vmul.f32 0.35355338, %v1546_v46  ;;  %v221_v49 = vpop.f32.mrb[5].mxu1 }
 0x233   :  { %v252_v51 = vmul.f32 0.35355338, %v221_v49  ;;  %v1547_v52 = vpop.f32.mrb[6].mxu1 }
 0x234   :  { %v255_v54 = vmul.f32 0.35355338, %v1547_v52  ;;  %v224_v55 = vpop.f32.mrb[7].mxu1  ;;  %v262_v56 = vadd.f32 %v254_v48, %v1914_v47 }
 0x235   :  { %v260_v57 = vadd.f32 %v252_v51, %v1919_v50  ;;  %v253_v58 = vmul.f32 0.35355338, %v224_v55 }
 0x236   :  { %v275_v59 = vsel %vm268_vm2, %v262_v56, -inf  ;;  %v263_v60 = vadd.f32 %v255_v54, %v1924_v53 }
 0x237   :  { %276 = vmax.xlane.f32.xlu1 %v275_v59  ;;  %v269_v61 = vsel %vm268_vm2, %v260_v57, -inf  ;;  %v261_v9 = vadd.f32 %v253_v58, %v1934_v62 }
 0x238   :  { %270 = vmax.xlane.f32.xlu0 %v269_v61  ;;  %v278_v8 = vsel %vm268_vm2, %v263_v60, -inf }
 0x239   :  { %v1550_v63 = vpop.f32.mrb[8].mxu1  ;;  %v272_v14 = vsel %vm268_vm2, %v261_v9, -inf }
 0x23a   :  { %v258_v5 = vmul.f32 0.35355338, %v1550_v63  ;;  %v237_v6 = vpop.f32.mrb[9].mxu1 }
 0x23b   :  { %279 = vmax.xlane.f32.xlu1 %v278_v8  ;;  %v1551_v10 = vpop.f32.mrb[10].mxu1  ;;  %v256_v13 = vmul.f32 0.35355338, %v237_v6 }
 0x23c   :  { %v240_v12 = vpop.f32.mrb[11].mxu1  ;;  %v266_v15 = vadd.f32 %v258_v5, %v1941_v11  ;;  %v259_v26 = vmul.f32 0.35355338, %v1551_v10 }
 0x23d   :  { %v257_v19 = vmul.f32 0.35355338, %v240_v12  ;;  %v264_v21 = vadd.f32 %v256_v13, %v1948_v18 }
 0x23e   :  { %v287_v20 = vsel %vm268_vm2, %v266_v15, -inf  ;;  %v267_v32 = vadd.f32 %v259_v26, %v1962_v30 }
 0x23f   :  { %273 = vmax.xlane.f32.xlu1 %v272_v14  ;;  %v281_v28 = vsel %vm268_vm2, %v264_v21, -inf  ;;  %v265_v29 = vadd.f32 %v257_v19, %v1955_v25 }
 0x240   :  { %v290_v33 = vsel %vm268_vm2, %v267_v32, -inf }
 0x241   :  { %v284_v31 = vsel %vm268_vm2, %v265_v29, -inf }
 0x243   :  { %288 = vmax.xlane.f32.xlu1 %v287_v20 }
 0x247   :  { %282 = vmax.xlane.f32.xlu1 %v281_v28 }
 0x24b   :  { %285 = vmax.xlane.f32.xlu1 %v284_v31 }
 0x24f   :  { %291 = vmax.xlane.f32.xlu1 %v290_v33 }
 0x2c4   :  { %v277_v34 = vpop.xlane.xlu1 %276 }
 0x2c5   :  { %v295_v36 = vsub.f32 %v262_v56, %v277_v34  ;;  %v271_v37 = vpop.xlane.xlu0 %270 }
 0x2c6   :  { %v293_v38 = vsub.f32 %v260_v57, %v271_v37 }
 0x2c7   :  { %v305_v39 = vmul.f32 1.442695, %v295_v36 }
 0x2c8   :  { %v301_v40 = vmul.f32 1.442695, %v293_v38  ;;  %v280_v41 = vpop.xlane.xlu1 %279 }
 0x2c9   :  { %1677 = vpow2.f32 %v305_v39  ;;  %v296_v42 = vsub.f32 %v263_v60, %v280_v41 }
 0x2ca   :  { %1679 = vpow2.f32 %v301_v40 }
 0x2cb   :  { %v307_v45 = vmul.f32 1.442695, %v296_v42 }
 0x2cc   :  { %v274_v43 = vpop.xlane.xlu1 %273 }
 0x2cd   :  { %v294_v44 = vsub.f32 %v261_v9, %v274_v43 }
 0x2cf   :  { %v303_v46 = vmul.f32 1.442695, %v294_v44 }
 0x2d0   :  { %v289_v48 = vpop.xlane.xlu1 %288 }
 0x2d1   :  { %1681 = vpow2.f32 %v303_v46  ;;  %v299_v49 = vsub.f32 %v266_v15, %v289_v48  ;;  %v1659_v48 = vld [vmem:[%s2264_s3 + $0x4] ss:$8 sps:$4 sm:$0xff]  }
 0x2d2   :  { %1683 = vpow2.f32 %v307_v45 }
 0x2d3   :  { %v1967_v51 = vpop.eup %1677  ;;  %v313_v52 = vmul.f32 1.442695, %v299_v49 }
 0x2d4   :  { %v1680_v54 = vpop.eup %1679  ;;  %v283_v55 = vpop.xlane.xlu1 %282  ;;  %v323_v56 = vsel %vm268_vm2, %v1967_v51, 0.0 }
 0x2d5   :  { %1685 = vpow2.f32 %v313_v52  ;;  %v297_v57 = vsub.f32 %v264_v21, %v283_v55  ;;  %324 = vadd.xlane.f32.xlu0 %v323_v56  ;;  %v317_v58 = vsel %vm268_vm2, %v1680_v54, 0.0 }
 0x2d6   :  { %318 = vadd.xlane.f32.xlu1 %v317_v58 }
 0x2d7   :  { %v309_v59 = vmul.f32 1.442695, %v297_v57 }
 0x2d8   :  { %v286_v60 = vpop.xlane.xlu1 %285 }
 0x2d9   :  { %1687 = vpow2.f32 %v309_v59  ;;  %v298_v61 = vsub.f32 %v265_v29, %v286_v60 }
 0x2db   :  { %v1682_v63 = vpop.eup %1681  ;;  %v311_v5 = vmul.f32 1.442695, %v298_v61 }
 0x2dc   :  { %v292_v6 = vpop.xlane.xlu1 %291  ;;  %v320_v8 = vsel %vm268_vm2, %v1682_v63, 0.0  ;;  %v1684_v9 = vpop.eup %1683 }
 0x2dd   :  { %1689 = vpow2.f32 %v311_v5  ;;  %v300_v10 = vsub.f32 %v267_v32, %v292_v6  ;;  %321 = vadd.xlane.f32.xlu1 %v320_v8  ;;  %v326_v15 = vsel %vm268_vm2, %v1684_v9, 0.0 }
 0x2df   :  { %v1973_v12 = vpop.eup %1685  ;;  %v315_v13 = vmul.f32 1.442695, %v300_v10 }
 0x2e0   :  { %v335_v14 = vsel %vm268_vm2, %v1973_v12, 0.0 }
 0x2e1   :  { %1691 = vpow2.f32 %v315_v13  ;;  %336 = vadd.xlane.f32.xlu0 %v335_v14  ;;  %327 = vadd.xlane.f32.xlu1 %v326_v15 }
 0x2e3   :  { %v1688_v19 = vpop.eup %1687 }
 0x2e4   :  { %v329_v20 = vsel %vm268_vm2, %v1688_v19, 0.0 }
 0x2e5   :  { %330 = vadd.xlane.f32.xlu0 %v329_v20 }
 0x2e7   :  { %v1690_v21 = vpop.eup %1689 }
 0x2e8   :  { %v332_v26 = vsel %vm268_vm2, %v1690_v21, 0.0 }
 0x2e9   :  { %333 = vadd.xlane.f32.xlu1 %v332_v26 }
 0x2eb   :  { %v1692_v28 = vpop.eup %1691 }
 0x2ec   :  { %v338_v29 = vsel %vm268_vm2, %v1692_v28, 0.0 }
 0x2ed   :  { %339 = vadd.xlane.f32.xlu1 %v338_v29 }
 0x2fb   :  { %361 = vrot.lane.b32.xlu0 %v1894_v35, %s1793_s1 }
 0x2fe   :  { %468 = vrot.lane.b32.xlu1 %v1836_v0, %s1794_s24 }
 0x302   :  { %470 = vrot.lane.b32.xlu1 %v1845_v2, %s1794_s24 }
 0x362   :  { %v325_v32 = vpop.xlane.xlu0 %324 }
 0x363   :  { %v319_v31 = vpop.xlane.xlu1 %318 }
 0x364   :  { %1693 = vrcp.f32 %v319_v31 }
 0x36a   :  { %v322_v33 = vpop.xlane.xlu1 %321 }
 0x36b   :  { %1695 = vrcp.f32 %v322_v33 }
 0x36c   :  { %1697 = vrcp.f32 %v325_v32 }
 0x36e   :  { %v337_v34 = vpop.xlane.xlu0 %336  ;;  %v328_v36 = vpop.xlane.xlu1 %327 }
 0x36f   :  { %1699 = vrcp.f32 %v328_v36  ;;  %v1694_v38 = vpop.eup %1693 }
 0x370   :  { %v349_v41 = vmul.f32 %v1694_v38, %v1680_v54  ;;  %v1662_v54 = vld [vmem:[%s2264_s3 + $0x14] ss:$8 sps:$4 sm:$0xff]  }
 0x372   :  { %v331_v37 = vpop.xlane.xlu0 %330 }
 0x373   :  { %1701 = vrcp.f32 %v331_v37 }
 0x375   :  { %v1696_v39 = vpop.eup %1695 }
 0x376   :  { %v362_v35 = vpop.permute.xlu0 %361  ;;  %v334_v40 = vpop.xlane.xlu1 %333  ;;  %v350_v0 = vmul.f32 %v1696_v39, %v1682_v63 }
 0x377   :  { %1703 = vrcp.f32 %v334_v40  ;;  %1552 = vmatprep.subr.bf16.mxu0 %v362_v35  ;;  %v1698_v2 = vpop.eup %1697 }
 0x378   :  { %1553 = vmatpush3.bf16.msra.mxu0 %v362_v35  ;;  %v357_v42 = vpack.c.bf16 %v350_v0, %v349_v41  ;;  %1705 = vrcp.f32 %v337_v34  ;;  %v351_v45 = vmul.f32 %v1698_v2, %v1967_v51 }
 0x379   :  { %1570 = vmatprep.subr.bf16.mxu0 %v1789_v1  ;;  %v1700_v43 = vpop.eup %1699 }
 0x37a   :  { %1554 = vmatprep.mubr.msk.bf16.mxu0 %vm268_vm2, %v357_v42  ;;  %v340_v44 = vpop.xlane.xlu1 %339  ;;  %v352_v46 = vmul.f32 %v1700_v43, %v1684_v9 }
 0x37b   :  { %1707 = vrcp.f32 %v340_v44 }
 0x37c   :  { %v358_v49 = vpack.c.bf16 %v352_v46, %v351_v45 }
 0x37d   :  { %v1702_v52 = vpop.eup %1701 }
 0x37e   :  { %1555 = vmatmul.mubr.msk.bf16.vlgmr.msra.gmra.mrb[0].mxu0 %vm268_vm2, %v358_v49  ;;  %v353_v56 = vmul.f32 %v1702_v52, %v1688_v19  ;;  %v469_v5 = vpop.permute.xlu1 %468 }
 0x37f   :  { %1571 = vmatpush3.bf16.msra.mxu0 %v1659_v48  ;;  %1563 = vmatpush3.bf16.msra.mxu1 %v469_v5  ;;  %v466_v48 = vsub.s32 1, %v1862_v7 }
 0x380   :  { %1572 = vmatprep.subr.bf16.mxu0 %v1789_v1  ;;  %1564 = vmatprep.subr.bf16.mxu1 %v1789_v1 }
 0x381   :  { %v1704_v55 = vpop.eup %1703  ;;  %v467_v49 = vrot.slane %v1874_v17, %v466_v48 }
 0x382   :  { %v354_v57 = vmul.f32 %v1704_v55, %v1690_v21  ;;  %v1706_v51 = vpop.eup %1705  ;;  %v471_v6 = vpop.permute.xlu1 %470 }
 0x383   :  { %1573 = vmatpush3.bf16.msra.mxu0 %v1662_v54  ;;  %v355_v60 = vmul.f32 %v1706_v51, %v1973_v12  ;;  %1565 = vmatpush3.bf16.msra.mxu1 %v471_v6 }
 0x384   :  { %v359_v58 = vpack.c.bf16 %v354_v57, %v353_v56  ;;  %1590 = vmatprep.subr.bf16.mxu0 %v1789_v1  ;;  %1578 = vmatprep.subr.bf16.mxu1 %v1789_v1 }
 0x385   :  { %v1708_v59 = vpop.eup %1707 }
 0x386   :  { %1558 = vmatprep.mubr.msk.bf16.mxu0 %vm268_vm2, %v359_v58  ;;  %v356_v61 = vmul.f32 %v1708_v59, %v1692_v28 }
 0x388   :  { %v360_v63 = vpack.c.bf16 %v356_v61, %v355_v60 }
 0x38a   :  { %1559 = vmatmul.mubr.msk.bf16.gmra.mrb[4].mxu0 %vm268_vm2, %v360_v63 }
 0x38b   :  { %1574 = vmatprep.mubr.msk.bf16.mxu0 %vm1790_vm0, %v1789_v1 }
 0x451   :  { %v1556_v8 = vpop.f32.mrb[0].mxu0 }
 0x452   :  { %v443_v9 = vmul.f32 %v1556_v8, %v1882_v23  ;;  %v410_v10 = vpop.f32.mrb[1].mxu0 }
 0x453   :  { %v441_v12 = vmul.f32 %v410_v10, %v1879_v22  ;;  %v1557_v13 = vpop.f32.mrb[2].mxu0 }
 0x454   :  { %v450_v14 = vsel %vm66_vm1, %v443_v9, 0.0  ;;  %v444_v15 = vmul.f32 %v1557_v13, %v1882_v23  ;;  %v413_v19 = vpop.f32.mrb[3].mxu0 }
 0x455   :  { %v449_v20 = vsel %vm66_vm1, %v441_v12, 0.0  ;;  %v442_v21 = vmul.f32 %v413_v19, %v1879_v22 }
 0x456   :  { %v451_v26 = vadd.f32 %v450_v14, %v449_v20  ;;  %v457_v28 = vsel %vm66_vm1, %v444_v15, 0.0 }
 0x457   :  { %v456_v29 = vsel %vm66_vm1, %v442_v21, 0.0 }
 0x458   :  { %v458_v31 = vadd.f32 %v457_v28, %v456_v29  ;;  %v549_v28 = vsub.s32 4, %v1862_v7 }
 0x45d   :  { %v1560_v32 = vpop.f32.mrb[4].mxu0 }
 0x45e   :  { %v426_v33 = vpop.f32.mrb[5].mxu0  ;;  %v447_v34 = vmul.f32 %v1560_v32, %v1888_v27  ;;  %v555_v32 = vsub.s32 5, %v1862_v7 }
 0x45f   :  { %v445_v36 = vmul.f32 %v426_v33, %v1885_v24  ;;  %v1561_v37 = vpop.f32.mrb[6].mxu0 }
 0x460   :  { %v429_v38 = vpop.f32.mrb[7].mxu0  ;;  %v448_v35 = vmul.f32 %v1561_v37, %v1888_v27  ;;  %v454_v0 = vsel %vm66_vm1, %v447_v34, 0.0 }
 0x461   :  { %v452_v39 = vsel %vm66_vm1, %v445_v36, 0.0  ;;  %v446_v40 = vmul.f32 %v429_v38, %v1885_v24  ;;  %v556_v36 = vrot.slane %v1874_v17, %v555_v32 }
 0x462   :  { %v453_v41 = vadd.f32 %v452_v39, %v451_v26  ;;  %v461_v44 = vsel %vm66_vm1, %v448_v35, 0.0 }
 0x463   :  { %v459_v2 = vsel %vm66_vm1, %v446_v40, 0.0 }
 0x464   :  { %v455_v42 = vadd.f32 %v454_v0, %v453_v41  ;;  %v460_v43 = vadd.f32 %v459_v2, %v458_v31  ;;  %v550_v31 = vrot.slane %v1874_v17, %v549_v28  ;;  %v1663_v0 = vld [vmem:[%s2265_s4] sm:$0xff]   ;;  %v1664_v2 = vld [vmem:[%s2265_s4 + $0x8] sm:$0xff]  }
 0x466   :  { %v462_v45 = vadd.f32 %v461_v44, %v460_v43  ;;  %v1666_v43 = vld [vmem:[%s2265_s4 + $0x18] sm:$0xff]   ;;  %v562_v44 = vsub.s32 2, %v1862_v7 }
 0x468   :  { %v463_v46 = vpack.c.bf16 %v462_v45, %v455_v42  ;;  %v1665_v42 = vld [vmem:[%s2265_s4 + $0x10] sm:$0xff]   ;;  %v563_v45 = vrot.slane %v1874_v17, %v562_v44 }
 0x46a   :  { %1567 = vmatmul.mubr.msk.bf16.vlgmr.msra.gmra.mrb[12].mxu1 %vm66_vm1, %v463_v46 }
 0x46b   :  { %1586 = vmatprep.mubr.msk.bf16.mxu1 %vm1790_vm0, %v1789_v1  ;;  %1579 = vmatpush3.bf16.msra.mxu1 %v1663_v0 }
 0x46c   :  { %1580 = vmatprep.subr.bf16.mxu1 %v1789_v1 }
 0x46f   :  { %1581 = vmatpush3.bf16.msra.mxu1 %v1664_v2 }
 0x470   :  { %1582 = vmatprep.subr.bf16.mxu1 %v1789_v1 }
 0x473   :  { %1583 = vmatpush3.bf16.msra.mxu1 %v1665_v42 }
 0x474   :  { %1584 = vmatprep.subr.bf16.mxu1 %v1789_v1 }
 0x477   :  { %1585 = vmatpush3.bf16.msra.mxu1 %v1666_v43 }
 0x53d   :  { %v511_v52 = vpop.f32.mrb[12].mxu1 }
 0x53e   :  { %v512_v54 = vadd.f32 %v511_v52, %v467_v49  ;;  %v1568_v55 = vpop.f32.mrb[13].mxu1 }
 0x53f   :  { %v514_v56 = vpop.f32.mrb[14].mxu1 }
 0x540   :  { %v515_v57 = vadd.f32 %v514_v56, %v467_v49  ;;  %v1569_v51 = vpop.f32.mrb[15].mxu1  ;;  %v518_v58 = vadd.f32 %v512_v54, %v1850_v3 }
 0x542   :  { %v520_v59 = vsel %vm66_vm1, %v518_v58, 0.0  ;;  %v519_v60 = vadd.f32 %v515_v57, %v1856_v4 }
 0x543   :  { %521 = vadd.xlane.f32.xlu0 %v520_v59 }
 0x544   :  { %v523_v61 = vsel %vm66_vm1, %v519_v60, 0.0 }
 0x545   :  { %524 = vadd.xlane.f32.xlu1 %v523_v61 }
 0x5d0   :  { %v522_v63 = vpop.xlane.xlu0 %521 }
 0x5d1   :  { %v527_v5 = vmul.f32 0.03125, %v522_v63 }
 0x5d2   :  { %v525_v6 = vpop.xlane.xlu1 %524 }
 0x5d3   :  { %v529_v8 = vsub.f32 %v518_v58, %v527_v5  ;;  %v528_v9 = vmul.f32 0.03125, %v525_v6 }
 0x5d5   :  { %v530_v10 = vsub.f32 %v519_v60, %v528_v9  ;;  %v531_v12 = vmul.f32 %v529_v8, %v529_v8 }
 0x5d7   :  { %v533_v13 = vsel %vm66_vm1, %v531_v12, 0.0  ;;  %v532_v14 = vmul.f32 %v530_v10, %v530_v10 }
 0x5d8   :  { %534 = vadd.xlane.f32.xlu0 %v533_v13 }
 0x5d9   :  { %v536_v3 = vsel %vm66_vm1, %v532_v14, 0.0 }
 0x5dc   :  { %537 = vadd.xlane.f32.xlu0 %v536_v3 }
 0x665   :  { %v535_v15 = vpop.xlane.xlu0 %534 }
 0x666   :  { %v539_v4 = vmul.f32 0.03125, %v535_v15 }
 0x668   :  { %v541_v19 = vadd.f32 1e-05, %v539_v4 }
 0x669   :  { %v538_v20 = vpop.xlane.xlu0 %537 }
 0x66a   :  { %1709 = vrsqrt.f32 %v541_v19  ;;  %v540_v21 = vmul.f32 0.03125, %v538_v20  ;;  %v637_v20 = vsub.s32 3, %v1862_v7 }
 0x66c   :  { %v542_v26 = vadd.f32 1e-05, %v540_v21  ;;  %v638_v21 = vrot.slane %v1874_v17, %v637_v20 }
 0x66e   :  { %1711 = vrsqrt.f32 %v542_v26 }
 0x674   :  { %v1710_v29 = vpop.eup %1709 }
 0x675   :  { %v545_v33 = vmul.f32 %v1710_v29, %v529_v8 }
 0x677   :  { %v551_v37 = vmul.f32 %v550_v31, %v545_v33 }
 0x678   :  { %v1712_v34 = vpop.eup %1711 }
 0x679   :  { %v546_v38 = vmul.f32 %v1712_v34, %v530_v10  ;;  %v557_v35 = vadd.f32 %v556_v36, %v551_v37 }
 0x67b   :  { %v552_v39 = vmul.f32 %v550_v31, %v546_v38 }
 0x67d   :  { %v558_v40 = vadd.f32 %v556_v36, %v552_v39 }
 0x67f   :  { %v559_v41 = vpack.c.bf16 %v558_v40, %v557_v35 }
 0x681   :  { %1575 = vmatmul.mubr.msk.bf16.vlgmr.msra.gmra.mrb[8].mxu0 %vm66_vm1, %v559_v41 }
 0x682   :  { %1594 = vmatprep.mubr.msk.bf16.mxu0 %vm1790_vm0, %v1789_v1 }
 0x754   :  { %v609_v46 = vpop.f32.mrb[8].mxu0 }
 0x755   :  { %v610_v49 = vadd.f32 %v609_v46, %v563_v45  ;;  %v1576_v52 = vpop.f32.mrb[9].mxu0 }
 0x756   :  { %v612_v54 = vpop.f32.mrb[10].mxu0 }
 0x757   :  { %v618_v55 = vmul.f32 0.044715, %v610_v49  ;;  %v613_v56 = vadd.f32 %v612_v54, %v563_v45  ;;  %v1577_v57 = vpop.f32.mrb[11].mxu0  ;;  %v616_v13 = vmul.f32 0.5, %v610_v49 }
 0x759   :  { %v620_v51 = vmul.f32 %v618_v55, %v610_v49  ;;  %v619_v58 = vmul.f32 0.044715, %v613_v56  ;;  %v617_v14 = vmul.f32 0.5, %v613_v56  ;;  %v2083_v55 = vld [vmem:[%s2264_s3 + $0x30] ss:$8 sps:$4 sm:$0xff]  }
 0x75b   :  { %v622_v59 = vmul.f32 %v620_v51, %v610_v49  ;;  %v621_v60 = vmul.f32 %v619_v58, %v613_v56 }
 0x75d   :  { %v624_v61 = vadd.f32 %v622_v59, %v610_v49  ;;  %v623_v63 = vmul.f32 %v621_v60, %v613_v56 }
 0x75f   :  { %v626_v5 = vmul.f32 0.7978846, %v624_v61  ;;  %v625_v6 = vadd.f32 %v623_v63, %v613_v56  ;;  %v738_v61 = vsub.s32 6, %v1862_v7 }
 0x761   :  { %1713 = vtanh.f32 %v626_v5  ;;  %v627_v8 = vmul.f32 0.7978846, %v625_v6  ;;  %v739_v63 = vrot.slane %v1874_v17, %v738_v61  ;;  %v744_v5 = vsub.s32 7, %v1862_v7 }
 0x763   :  { %1715 = vtanh.f32 %v627_v8 }
 0x76b   :  { %v1714_v9 = vpop.eup %1713 }
 0x76c   :  { %v630_v10 = vadd.f32 1.0, %v1714_v9 }
 0x76d   :  { %v1716_v12 = vpop.eup %1715 }
 0x76e   :  { %v631_v3 = vadd.f32 1.0, %v1716_v12  ;;  %v632_v15 = vmul.f32 %v630_v10, %v616_v13  ;;  %v745_v13 = vrot.slane %v1874_v17, %v744_v5 }
 0x770   :  { %v633_v4 = vmul.f32 %v631_v3, %v617_v14 }
 0x772   :  { %v634_v19 = vpack.c.bf16 %v633_v4, %v632_v15 }
 0x774   :  { %1587 = vmatmul.mubr.msk.bf16.vlgmr.msra.gmra.mrb[16].mxu1 %vm663_vm3, %v634_v19  ;;  %v2105_v19 = vld [vmem:[%s2266_s5 + $0x8] sm:$0xff] }
 0x847   :  { %v701_v26 = vpop.f32.mrb[16].mxu1 }
 0x848   :  { %v702_v29 = vadd.f32 %v701_v26, %v638_v21  ;;  %v1588_v31 = vpop.f32.mrb[17].mxu1 }
 0x849   :  { %v704_v33 = vpop.f32.mrb[18].mxu1 }
 0x84a   :  { %v705_v34 = vadd.f32 %v704_v33, %v638_v21  ;;  %v1589_v36 = vpop.f32.mrb[19].mxu1  ;;  %v708_v37 = vadd.f32 %v702_v29, %v557_v35  ;;  %v768_v21 = vrot.slane %v2105_v19, %v1869_v16 }
 0x84c   :  { %v710_v38 = vsel %vm66_vm1, %v708_v37, 0.0  ;;  %v709_v39 = vadd.f32 %v705_v34, %v558_v40  ;;  %v2077_v40 = vld [vmem:[%s2264_s3 + $0x20] ss:$8 sps:$4 sm:$0xff]  }
 0x84d   :  { %711 = vadd.xlane.f32.xlu1 %v710_v38  ;;  %1591 = vmatpush3.bf16.msra.mxu0 %v2077_v40 }
 0x84e   :  { %v713_v41 = vsel %vm66_vm1, %v709_v39, 0.0  ;;  %1592 = vmatprep.subr.bf16.mxu0 %v1789_v1 }
 0x84f   :  { %714 = vadd.xlane.f32.xlu0 %v713_v41 }
 0x851   :  { %1593 = vmatpush3.bf16.msra.mxu0 %v2083_v55 }
 0x8da   :  { %v712_v0 = vpop.xlane.xlu1 %711 }
 0x8db   :  { %v716_v2 = vmul.f32 0.03125, %v712_v0 }
 0x8dc   :  { %v715_v42 = vpop.xlane.xlu0 %714 }
 0x8dd   :  { %v718_v43 = vsub.f32 %v708_v37, %v716_v2  ;;  %v717_v45 = vmul.f32 0.03125, %v715_v42 }
 0x8df   :  { %v719_v46 = vsub.f32 %v709_v39, %v717_v45  ;;  %v720_v49 = vmul.f32 %v718_v43, %v718_v43 }
 0x8e1   :  { %v722_v52 = vsel %vm66_vm1, %v720_v49, 0.0  ;;  %v721_v54 = vmul.f32 %v719_v46, %v719_v46 }
 0x8e2   :  { %723 = vadd.xlane.f32.xlu1 %v722_v52 }
 0x8e3   :  { %v725_v35 = vsel %vm66_vm1, %v721_v54, 0.0 }
 0x8e4   :  { %726 = vadd.xlane.f32.xlu0 %v725_v35 }
 0x96f   :  { %v724_v56 = vpop.xlane.xlu1 %723 }
 0x970   :  { %v728_v57 = vmul.f32 0.03125, %v724_v56 }
 0x971   :  { %v727_v51 = vpop.xlane.xlu0 %726 }
 0x972   :  { %v730_v58 = vadd.f32 1e-05, %v728_v57  ;;  %v729_v59 = vmul.f32 0.03125, %v727_v51 }
 0x974   :  { %1717 = vrsqrt.f32 %v730_v58  ;;  %v731_v60 = vadd.f32 1e-05, %v729_v59 }
 0x976   :  { %1719 = vrsqrt.f32 %v731_v60 }
 0x97e   :  { %v1718_v6 = vpop.eup %1717 }
 0x97f   :  { %v734_v8 = vmul.f32 %v1718_v6, %v718_v43 }
 0x980   :  { %v1720_v9 = vpop.eup %1719 }
 0x981   :  { %v740_v10 = vmul.f32 %v739_v63, %v734_v8  ;;  %v735_v12 = vmul.f32 %v1720_v9, %v719_v46 }
 0x983   :  { %v741_v14 = vmul.f32 %v739_v63, %v735_v12  ;;  %v2095_v3 = vadd.f32 %v745_v13, %v740_v10 }
 0x985   :  { %v2097_v15 = vadd.f32 %v745_v13, %v741_v14 }
 0x987   :  { %v764_v4 = vpack.c.bf16 %v2097_v15, %v2095_v3 }
 0x989   :  { %1595 = vmatmul.mubr.msk.bf16.vlgmr.msra.gmra.mrb[12].mxu0 %vm66_vm1, %v764_v4 }
 0xa5c   :  { %v818_v26 = vpop.f32.mrb[12].mxu0 }
 0xa5d   :  { %v819_v17 = vadd.f32 %v818_v26, %v768_v21  ;;  %v1596_v29 = vpop.f32.mrb[13].mxu0 }
 0xa5e   :  { %v821_v31 = vpop.f32.mrb[14].mxu0 }
 0xa5f   :  { %v822_v33 = vadd.f32 %v821_v31, %v768_v21  ;;  %v1597_v34 = vpop.f32.mrb[15].mxu0  ;;  %v827_v36 = vmul.f32 %v819_v17, %v1882_v23  ;;  %v825_v37 = vmul.f32 %v819_v17, %v1879_v22  ;;  %v829_v38 = vmul.f32 %v819_v17, %v1885_v24 }
 0xa60   :  { %v831_v2 = vmul.f32 %v819_v17, %v1888_v27 }
 0xa61   :  { %v828_v39 = vmul.f32 %v822_v33, %v1882_v23  ;;  %v2113_v41 = vpack.c.bf16 %v822_v33, %v819_v17  ;;  %v826_v0 = vmul.f32 %v822_v33, %v1879_v22  ;;  %v830_v16 = vmul.f32 %v822_v33, %v1885_v24 }
 0xa62   :  { %v832_v42 = vmul.f32 %v822_v33, %v1888_v27 }
 0xa63   :  { %839 = vrot.lane.b32.xlu1 %v2113_v41, %s1792_s2  ;;  %v833_v43 = vpack.c.bf16 %v826_v0, %v825_v37  ;;  %v834_v45 = vpack.c.bf16 %v828_v39, %v827_v36  ;;  %v835_v46 = vpack.c.bf16 %v830_v16, %v829_v38 }
 0xa64   :  { %v836_v49 = vpack.c.bf16 %v832_v42, %v831_v2 }
 0xa65   :  { %1600 = vmatprep.mubr.msk.bf16.mxu0 %vm66_vm1, %v833_v43 }
 0xad5   :  { %v840_v52 = vpop.permute.xlu1 %839 }
 0xad6   :  { %v854_v54 = vsel %vm66_vm1, %v840_v52, 0  ;;  %1647 = vmatprep.subr.msk.bf16.mxu0 %vm66_vm1, %v840_v52 }
 0xad7   :  { %1599 = vmatpush3.bf16.xpose.msra.mxu0 %v854_v54 }
 0xad8   :  { %1618 = vmatprep.subr.bf16.mxu0 %v1789_v1 }
 0xade   :  { %1601 = vmatmul.mubr.msk.bf16.vlgmr.msra.gmra.mrb[16].mxu0 %vm66_vm1, %v834_v45 }
 0xadf   :  { %1604 = vmatprep.mubr.msk.bf16.mxu0 %vm66_vm1, %v835_v46 }
 0xae6   :  { %1605 = vmatmul.mubr.msk.bf16.gmra.mrb[20].mxu0 %vm66_vm1, %v836_v49 }
 0xae7   :  { %1622 = vmatprep.mubr.msk.bf16.mxu0 %vm1790_vm0, %v1789_v1 }
 0xbb1   :  { %v1602_v35 = vpop.f32.mrb[16].mxu0 }
 0xbb2   :  { %v923_v56 = vmul.f32 0.35355338, %v1602_v35  ;;  %v890_v57 = vpop.f32.mrb[17].mxu0 }
 0xbb3   :  { %v921_v51 = vmul.f32 0.35355338, %v890_v57  ;;  %v1603_v58 = vpop.f32.mrb[18].mxu0 }
 0xbb4   :  { %v893_v59 = vpop.f32.mrb[19].mxu0  ;;  %v931_v60 = vadd.f32 %v923_v56, %v1914_v47  ;;  %v924_v63 = vmul.f32 0.35355338, %v1603_v58 }
 0xbb5   :  { %v929_v8 = vadd.f32 %v921_v51, %v1919_v50  ;;  %v922_v10 = vmul.f32 0.35355338, %v893_v59 }
 0xbb6   :  { %v943_v6 = vsel %vm268_vm2, %v931_v60, -inf  ;;  %v932_v14 = vadd.f32 %v924_v63, %v1924_v53 }
 0xbb7   :  { %944 = vmax.xlane.f32.xlu0 %v943_v6  ;;  %v937_v13 = vsel %vm268_vm2, %v929_v8, -inf  ;;  %v930_v31 = vadd.f32 %v922_v10, %v1934_v62 }
 0xbb8   :  { %v946_v29 = vsel %vm268_vm2, %v932_v14, -inf }
 0xbb9   :  { %v1606_v9 = vpop.f32.mrb[20].mxu0  ;;  %v940_v34 = vsel %vm268_vm2, %v930_v31, -inf }
 0xbba   :  { %v906_v12 = vpop.f32.mrb[21].mxu0  ;;  %v927_v47 = vmul.f32 0.35355338, %v1606_v9 }
 0xbbb   :  { %v925_v4 = vmul.f32 0.35355338, %v906_v12  ;;  %938 = vmax.xlane.f32.xlu0 %v937_v13  ;;  %v1607_v21 = vpop.f32.mrb[22].mxu0 }
 0xbbc   :  { %v909_v26 = vpop.f32.mrb[23].mxu0  ;;  %v935_v53 = vadd.f32 %v927_v47, %v1941_v11  ;;  %v928_v36 = vmul.f32 0.35355338, %v1607_v21 }
 0xbbd   :  { %v933_v17 = vadd.f32 %v925_v4, %v1948_v18  ;;  %v926_v33 = vmul.f32 0.35355338, %v909_v26 }
 0xbbe   :  { %v955_v37 = vsel %vm268_vm2, %v935_v53, -inf  ;;  %v936_v62 = vadd.f32 %v928_v36, %v1962_v30 }
 0xbbf   :  { %947 = vmax.xlane.f32.xlu0 %v946_v29  ;;  %v949_v50 = vsel %vm268_vm2, %v933_v17, -inf  ;;  %v934_v18 = vadd.f32 %v926_v33, %v1955_v25 }
 0xbc0   :  { %950 = vmax.xlane.f32.xlu1 %v949_v50  ;;  %v958_v39 = vsel %vm268_vm2, %v936_v62, -inf }
 0xbc1   :  { %v952_v38 = vsel %vm268_vm2, %v934_v18, -inf }
 0xbc3   :  { %941 = vmax.xlane.f32.xlu0 %v940_v34 }
 0xbc7   :  { %956 = vmax.xlane.f32.xlu0 %v955_v37 }
 0xbcb   :  { %953 = vmax.xlane.f32.xlu0 %v952_v38 }
 0xbcf   :  { %959 = vmax.xlane.f32.xlu0 %v958_v39 }
 0xc44   :  { %v945_v0 = vpop.xlane.xlu0 %944 }
 0xc45   :  { %v963_v16 = vsub.f32 %v931_v60, %v945_v0 }
 0xc47   :  { %v973_v2 = vmul.f32 1.442695, %v963_v16 }
 0xc48   :  { %v939_v42 = vpop.xlane.xlu0 %938 }
 0xc49   :  { %1721 = vpow2.f32 %v973_v2  ;;  %v961_v11 = vsub.f32 %v929_v8, %v939_v42 }
 0xc4b   :  { %v969_v43 = vmul.f32 1.442695, %v961_v11 }
 0xc4c   :  { %v948_v45 = vpop.xlane.xlu0 %947 }
 0xc4d   :  { %1723 = vpow2.f32 %v969_v43  ;;  %v964_v46 = vsub.f32 %v932_v14, %v948_v45  ;;  %v951_v25 = vpop.xlane.xlu1 %950 }
 0xc4e   :  { %v965_v52 = vsub.f32 %v933_v17, %v951_v25 }
 0xc4f   :  { %v975_v49 = vmul.f32 1.442695, %v964_v46 }
 0xc50   :  { %v942_v54 = vpop.xlane.xlu0 %941  ;;  %v977_v56 = vmul.f32 1.442695, %v965_v52 }
 0xc51   :  { %1725 = vpow2.f32 %v975_v49  ;;  %v962_v30 = vsub.f32 %v930_v31, %v942_v54 }
 0xc53   :  { %v2146_v35 = vpop.eup %1721  ;;  %v971_v57 = vmul.f32 1.442695, %v962_v30 }
 0xc54   :  { %v957_v51 = vpop.xlane.xlu0 %956  ;;  %v991_v58 = vsel %vm268_vm2, %v2146_v35, 0.0 }
 0xc55   :  { %1727 = vpow2.f32 %v971_v57  ;;  %v967_v59 = vsub.f32 %v935_v53, %v957_v51  ;;  %992 = vadd.xlane.f32.xlu0 %v991_v58 }
 0xc56   :  { %1729 = vpow2.f32 %v977_v56 }
 0xc57   :  { %v1724_v60 = vpop.eup %1723  ;;  %v981_v63 = vmul.f32 1.442695, %v967_v59 }
 0xc58   :  { %v954_v6 = vpop.xlane.xlu0 %953  ;;  %v985_v8 = vsel %vm268_vm2, %v1724_v60, 0.0 }
 0xc59   :  { %1731 = vpow2.f32 %v981_v63  ;;  %v966_v9 = vsub.f32 %v934_v18, %v954_v6  ;;  %986 = vadd.xlane.f32.xlu0 %v985_v8 }
 0xc5b   :  { %v1726_v10 = vpop.eup %1725  ;;  %v979_v12 = vmul.f32 1.442695, %v966_v9 }
 0xc5c   :  { %v960_v13 = vpop.xlane.xlu0 %959  ;;  %v994_v14 = vsel %vm268_vm2, %v1726_v10, 0.0 }
 0xc5d   :  { %1733 = vpow2.f32 %v979_v12  ;;  %v968_v4 = vsub.f32 %v936_v62, %v960_v13  ;;  %995 = vadd.xlane.f32.xlu0 %v994_v14 }
 0xc5f   :  { %v1728_v21 = vpop.eup %1727  ;;  %v983_v26 = vmul.f32 1.442695, %v968_v4 }
 0xc60   :  { %v988_v17 = vsel %vm268_vm2, %v1728_v21, 0.0  ;;  %v1730_v47 = vpop.eup %1729 }
 0xc61   :  { %1735 = vpow2.f32 %v983_v26  ;;  %989 = vadd.xlane.f32.xlu0 %v988_v17  ;;  %v997_v50 = vsel %vm268_vm2, %v1730_v47, 0.0 }
 0xc63   :  { %v1732_v29 = vpop.eup %1731 }
 0xc64   :  { %v1003_v31 = vsel %vm268_vm2, %v1732_v29, 0.0 }
 0xc65   :  { %1004 = vadd.xlane.f32.xlu1 %v1003_v31  ;;  %998 = vadd.xlane.f32.xlu0 %v997_v50 }
 0xc67   :  { %v1734_v33 = vpop.eup %1733 }
 0xc68   :  { %v1000_v34 = vsel %vm268_vm2, %v1734_v33, 0.0 }
 0xc69   :  { %1001 = vadd.xlane.f32.xlu0 %v1000_v34 }
 0xc6b   :  { %v1736_v53 = vpop.eup %1735 }
 0xc6c   :  { %v1006_v36 = vsel %vm268_vm2, %v1736_v53, 0.0 }
 0xc6d   :  { %1007 = vadd.xlane.f32.xlu0 %v1006_v36 }
 0xc76   :  { %1029 = vrot.lane.b32.xlu1 %v2113_v41, %s1793_s1 }
 0xc7a   :  { %1138 = vrot.lane.b32.xlu1 %v2083_v55, %s1794_s24 }
 0xc83   :  { %1136 = vrot.lane.b32.xlu0 %v2077_v40, %s1794_s24 }
 0xce2   :  { %v993_v37 = vpop.xlane.xlu0 %992 }
 0xce6   :  { %v987_v18 = vpop.xlane.xlu0 %986 }
 0xcea   :  { %v996_v38 = vpop.xlane.xlu0 %995 }
 0xceb   :  { %1737 = vrcp.f32 %v996_v38 }
 0xcec   :  { %1739 = vrcp.f32 %v987_v18 }
 0xced   :  { %1741 = vrcp.f32 %v993_v37 }
 0xcee   :  { %v990_v62 = vpop.xlane.xlu0 %989 }
 0xcef   :  { %1743 = vrcp.f32 %v990_v62 }
 0xcf2   :  { %v1005_v39 = vpop.xlane.xlu1 %1004  ;;  %v999_v0 = vpop.xlane.xlu0 %998 }
 0xcf3   :  { %1745 = vrcp.f32 %v999_v0 }
 0xcf5   :  { %v1738_v16 = vpop.eup %1737 }
 0xcf6   :  { %v1030_v2 = vpop.permute.xlu1 %1029  ;;  %v1002_v41 = vpop.xlane.xlu0 %1001  ;;  %v1020_v11 = vmul.f32 %v1738_v16, %v1726_v10 }
 0xcf7   :  { %v1740_v42 = vpop.eup %1739  ;;  %1747 = vrcp.f32 %v1002_v41  ;;  %1608 = vmatprep.subr.bf16.mxu1 %v1030_v2 }
 0xcf8   :  { %v1742_v55 = vpop.eup %1741  ;;  %1609 = vmatpush3.bf16.msra.mxu1 %v1030_v2  ;;  %1749 = vrcp.f32 %v1005_v39  ;;  %v1017_v45 = vmul.f32 %v1740_v42, %v1724_v60 }
 0xcf9   :  { %v1744_v40 = vpop.eup %1743  ;;  %1626 = vmatprep.subr.bf16.mxu1 %v1789_v1  ;;  %v1019_v25 = vmul.f32 %v1742_v55, %v2146_v35 }
 0xcfa   :  { %v1008_v43 = vpop.xlane.xlu0 %1007  ;;  %v1018_v46 = vmul.f32 %v1744_v40, %v1728_v21  ;;  %v1139_v8 = vpop.permute.xlu1 %1138 }
 0xcfb   :  { %1751 = vrcp.f32 %v1008_v43  ;;  %v1026_v52 = vpack.c.bf16 %v1020_v11, %v1019_v25 }
 0xcfc   :  { %v1025_v49 = vpack.c.bf16 %v1018_v46, %v1017_v45 }
 0xcfd   :  { %v1746_v54 = vpop.eup %1745 }
 0xcfe   :  { %1610 = vmatprep.mubr.msk.bf16.mxu1 %vm268_vm2, %v1025_v49  ;;  %v1021_v56 = vmul.f32 %v1746_v54, %v1730_v47  ;;  %v1137_v35 = vpop.permute.xlu0 %1136 }
 0xcff   :  { %1611 = vmatmul.mubr.msk.bf16.vlgmr.msra.gmra.mrb[20].mxu1 %vm268_vm2, %v1026_v52  ;;  %1619 = vmatpush3.bf16.msra.mxu0 %v1137_v35  ;;  %v1672_v35 = vld [vmem:[%s2264_s3 + $0x34] ss:$8 sps:$4 sm:$0xff]  }
 0xd00   :  { %1620 = vmatprep.subr.bf16.mxu0 %v1789_v1 }
 0xd01   :  { %v1748_v30 = vpop.eup %1747 }
 0xd02   :  { %v1022_v57 = vmul.f32 %v1748_v30, %v1734_v33  ;;  %v1750_v51 = vpop.eup %1749 }
 0xd03   :  { %v1023_v60 = vmul.f32 %v1750_v51, %v1732_v29  ;;  %1621 = vmatpush3.bf16.msra.mxu0 %v1139_v8 }
 0xd04   :  { %v1027_v58 = vpack.c.bf16 %v1022_v57, %v1021_v56  ;;  %1634 = vmatprep.subr.bf16.mxu0 %v1789_v1 }
 0xd05   :  { %v1752_v59 = vpop.eup %1751 }
 0xd06   :  { %1614 = vmatprep.mubr.msk.bf16.mxu1 %vm268_vm2, %v1027_v58  ;;  %v1024_v63 = vmul.f32 %v1752_v59, %v1736_v53 }
 0xd08   :  { %v1028_v6 = vpack.c.bf16 %v1024_v63, %v1023_v60 }
 0xd0a   :  { %1615 = vmatmul.mubr.msk.bf16.gmra.mrb[24].mxu1 %vm268_vm2, %v1028_v6 }
 0xd0b   :  { %1630 = vmatprep.mubr.msk.bf16.mxu1 %vm1790_vm0, %v1789_v1 }
 0xdd2   :  { %v1612_v9 = vpop.f32.mrb[20].mxu1 }
 0xdd3   :  { %v1111_v10 = vmul.f32 %v1612_v9, %v1882_v23  ;;  %v1078_v12 = vpop.f32.mrb[21].mxu1 }
 0xdd4   :  { %v1109_v13 = vmul.f32 %v1078_v12, %v1879_v22  ;;  %v1613_v14 = vpop.f32.mrb[22].mxu1 }
 0xdd5   :  { %v1118_v4 = vsel %vm66_vm1, %v1111_v10, 0.0  ;;  %v1112_v21 = vmul.f32 %v1613_v14, %v1882_v23  ;;  %v1081_v26 = vpop.f32.mrb[23].mxu1 }
 0xdd6   :  { %v1117_v17 = vsel %vm66_vm1, %v1109_v13, 0.0  ;;  %v1110_v47 = vmul.f32 %v1081_v26, %v1879_v22 }
 0xdd7   :  { %v1119_v29 = vadd.f32 %v1118_v4, %v1117_v17  ;;  %v1125_v31 = vsel %vm66_vm1, %v1112_v21, 0.0  ;;  %v1217_v4 = vrot.slane %v2105_v19, %v549_v28  ;;  %v1674_v28 = vld [vmem:[%s2265_s4 + $0x28] sm:$0xff]  }
 0xdd8   :  { %v1124_v50 = vsel %vm66_vm1, %v1110_v47, 0.0  ;;  %v1223_v47 = vrot.slane %v2105_v19, %v555_v32  ;;  %v1675_v32 = vld [vmem:[%s2265_s4 + $0x30] sm:$0xff]  }
 0xdd9   :  { %v1126_v33 = vadd.f32 %v1125_v31, %v1124_v50 }
 0xddd   :  { %v1616_v34 = vpop.f32.mrb[24].mxu1 }
 0xdde   :  { %v1094_v53 = vpop.f32.mrb[25].mxu1  ;;  %v1115_v36 = vmul.f32 %v1616_v34, %v1888_v27 }
 0xddf   :  { %v1113_v37 = vmul.f32 %v1094_v53, %v1885_v24  ;;  %v1617_v18 = vpop.f32.mrb[26].mxu1 }
 0xde0   :  { %v1097_v38 = vpop.f32.mrb[27].mxu1  ;;  %v1116_v62 = vmul.f32 %v1617_v18, %v1888_v27  ;;  %v1122_v0 = vsel %vm66_vm1, %v1115_v36, 0.0  ;;  %v1673_v36 = vld [vmem:[%s2265_s4 + $0x20] sm:$0xff]   ;;  %v1230_v18 = vrot.slane %v2105_v19, %v562_v44 }
 0xde1   :  { %v1120_v23 = vsel %vm66_vm1, %v1113_v37, 0.0  ;;  %v1114_v22 = vmul.f32 %v1097_v38, %v1885_v24  ;;  %v1135_v24 = vrot.slane %v2105_v19, %v466_v48  ;;  %v1676_v37 = vld [vmem:[%s2265_s4 + $0x38] sm:$0xff]   ;;  %s1795_s4 = smov [#allocation2]  }
 0xde2   :  { %v1121_v39 = vadd.f32 %v1120_v23, %v1119_v29  ;;  %v1129_v42 = vsel %vm66_vm1, %v1116_v62, 0.0  ;;  %s1421_s26 = sshll.u32 %s1795_s4, 4  ;;  %s1422_s26 = int_to_ptr.vmem [resolvable:$true] %s1421_s26 }
 0xde3   :  { %v1127_v16 = vsel %vm66_vm1, %v1114_v22, 0.0  ;;  %s1765_s27 = scalar_lea.vmem %s1422_s26, 256  ;;  %p1770_p1 = scmp.lt.s32.totalorder %s1422_s26, %s1422_s26 }
 0xde4   :  { %v1123_v2 = vadd.f32 %v1122_v0, %v1121_v39  ;;  %v1128_v41 = vadd.f32 %v1127_v16, %v1126_v33  ;;  %p1766_p0 = scmp.ne.s32.totalorder %s1422_s26, %s1765_s27  ;;  %p1771_p2 = scmp.lt.s32.totalorder %s1765_s27, %s1765_s27 }
 0xde6   :  { %v1130_v55 = vadd.f32 %v1129_v42, %v1128_v41  ;;  %p1772_p3 = por %p1771_p2, %p1770_p1 }
 0xde8   :  { %v1131_v40 = vpack.c.bf16 %v1130_v55, %v1123_v2  ;;  %p1773_p4 = pnand %p1772_p3, %p1766_p0 }
 0xdea   :  { %1623 = vmatmul.mubr.msk.bf16.vlgmr.msra.gmra.mrb[24].mxu0 %vm66_vm1, %v1131_v40 }
 0xdeb   :  { %1642 = vmatprep.mubr.msk.bf16.mxu0 %vm1790_vm0, %v1789_v1  ;;  %1635 = vmatpush3.bf16.msra.mxu0 %v1673_v36  ;;  %v1411_v36 = vrot.slane %v2105_v19, %v744_v5 }
 0xdec   :  { %1636 = vmatprep.subr.bf16.mxu0 %v1789_v1 }
 0xdef   :  { %1637 = vmatpush3.bf16.msra.mxu0 %v1674_v28 }
 0xdf0   :  { %1638 = vmatprep.subr.bf16.mxu0 %v1789_v1 }
 0xdf3   :  { %1639 = vmatpush3.bf16.msra.mxu0 %v1675_v32 }
 0xdf4   :  { %1640 = vmatprep.subr.bf16.mxu0 %v1789_v1 }
 0xdf7   :  { %1641 = vmatpush3.bf16.msra.mxu0 %v1676_v37 }
 0xebd   :  { %v1179_v27 = vpop.f32.mrb[24].mxu0 }
 0xebe   :  { %v1180_v11 = vadd.f32 %v1179_v27, %v1135_v24  ;;  %v1624_v43 = vpop.f32.mrb[25].mxu0 }
 0xebf   :  { %v1182_v45 = vpop.f32.mrb[26].mxu0 }
 0xec0   :  { %v1183_v46 = vadd.f32 %v1182_v45, %v1135_v24  ;;  %v1625_v25 = vpop.f32.mrb[27].mxu0  ;;  %v1186_v49 = vadd.f32 %v1180_v11, %v2095_v3 }
 0xec2   :  { %v1188_v52 = vsel %vm66_vm1, %v1186_v49, 0.0  ;;  %v1187_v54 = vadd.f32 %v1183_v46, %v2097_v15  ;;  %v1671_v15 = vld [vmem:[%s2264_s3 + $0x24] ss:$8 sps:$4 sm:$0xff]  }
 0xec3   :  { %1189 = vadd.xlane.f32.xlu1 %v1188_v52  ;;  %1627 = vmatpush3.bf16.msra.mxu1 %v1671_v15 }
 0xec4   :  { %v1191_v30 = vsel %vm66_vm1, %v1187_v54, 0.0  ;;  %1628 = vmatprep.subr.bf16.mxu1 %v1789_v1 }
 0xec5   :  { %1192 = vadd.xlane.f32.xlu0 %v1191_v30 }
 0xec7   :  { %1629 = vmatpush3.bf16.msra.mxu1 %v1672_v35 }
 0xf50   :  { %v1190_v56 = vpop.xlane.xlu1 %1189 }
 0xf51   :  { %v1194_v57 = vmul.f32 0.03125, %v1190_v56  ;;  %v1305_v56 = vrot.slane %v2105_v19, %v637_v20 }
 0xf52   :  { %v1193_v51 = vpop.xlane.xlu0 %1192 }
 0xf53   :  { %v1196_v48 = vsub.f32 %v1186_v49, %v1194_v57  ;;  %v1195_v58 = vmul.f32 0.03125, %v1193_v51 }
 0xf55   :  { %v1197_v59 = vsub.f32 %v1187_v54, %v1195_v58  ;;  %v1198_v60 = vmul.f32 %v1196_v48, %v1196_v48 }
 0xf57   :  { %v1200_v63 = vsel %vm66_vm1, %v1198_v60, 0.0  ;;  %v1199_v6 = vmul.f32 %v1197_v59, %v1197_v59 }
 0xf58   :  { %1201 = vadd.xlane.f32.xlu0 %v1200_v63 }
 0xf59   :  { %v1203_v3 = vsel %vm66_vm1, %v1199_v6, 0.0 }
 0xf5a   :  { %1204 = vadd.xlane.f32.xlu1 %v1203_v3 }
 0xfe5   :  { %v1202_v8 = vpop.xlane.xlu0 %1201 }
 0xfe6   :  { %v1206_v9 = vmul.f32 0.03125, %v1202_v8 }
 0xfe7   :  { %v1205_v10 = vpop.xlane.xlu1 %1204 }
 0xfe8   :  { %v1208_v12 = vadd.f32 1e-05, %v1206_v9  ;;  %v1207_v13 = vmul.f32 0.03125, %v1205_v10 }
 0xfea   :  { %1753 = vrsqrt.f32 %v1208_v12  ;;  %v1209_v14 = vadd.f32 1e-05, %v1207_v13 }
 0xfec   :  { %1755 = vrsqrt.f32 %v1209_v14 }
 0xff4   :  { %v1754_v21 = vpop.eup %1753 }
 0xff5   :  { %v1212_v26 = vmul.f32 %v1754_v21, %v1196_v48 }
 0xff6   :  { %v1756_v17 = vpop.eup %1755 }
 0xff7   :  { %v1218_v29 = vmul.f32 %v1217_v4, %v1212_v26  ;;  %v1213_v31 = vmul.f32 %v1756_v17, %v1197_v59 }
 0xff9   :  { %v1219_v50 = vmul.f32 %v1217_v4, %v1213_v31  ;;  %v1224_v33 = vadd.f32 %v1223_v47, %v1218_v29 }
 0xffb   :  { %v1225_v34 = vadd.f32 %v1223_v47, %v1219_v50 }
 0xffd   :  { %v1226_v53 = vpack.c.bf16 %v1225_v34, %v1224_v33 }
 0xfff   :  { %1631 = vmatmul.mubr.msk.bf16.vlgmr.msra.gmra.mrb[28].mxu1 %vm66_vm1, %v1226_v53 }
0x10d2   :  { %v1276_v38 = vpop.f32.mrb[28].mxu1 }
0x10d3   :  { %v1277_v23 = vadd.f32 %v1276_v38, %v1230_v18  ;;  %v1632_v62 = vpop.f32.mrb[29].mxu1 }
0x10d4   :  { %v1279_v22 = vpop.f32.mrb[30].mxu1 }
0x10d5   :  { %v1285_v39 = vmul.f32 0.044715, %v1277_v23  ;;  %v1280_v0 = vadd.f32 %v1279_v22, %v1230_v18  ;;  %v1633_v16 = vpop.f32.mrb[31].mxu1  ;;  %v1283_v46 = vmul.f32 0.5, %v1277_v23 }
0x10d7   :  { %v1287_v2 = vmul.f32 %v1285_v39, %v1277_v23  ;;  %v1286_v41 = vmul.f32 0.044715, %v1280_v0  ;;  %v1284_v25 = vmul.f32 0.5, %v1280_v0 }
0x10d9   :  { %v1289_v42 = vmul.f32 %v1287_v2, %v1277_v23  ;;  %v1288_v55 = vmul.f32 %v1286_v41, %v1280_v0 }
0x10db   :  { %v1291_v40 = vadd.f32 %v1289_v42, %v1277_v23  ;;  %v1290_v24 = vmul.f32 %v1288_v55, %v1280_v0 }
0x10dd   :  { %v1293_v27 = vmul.f32 0.7978846, %v1291_v40  ;;  %v1292_v1 = vadd.f32 %v1290_v24, %v1280_v0 }
0x10df   :  { %1757 = vtanh.f32 %v1293_v27  ;;  %v1294_v11 = vmul.f32 0.7978846, %v1292_v1 }
0x10e1   :  { %1759 = vtanh.f32 %v1294_v11 }
0x10e9   :  { %v1758_v43 = vpop.eup %1757 }
0x10ea   :  { %v1297_v44 = vadd.f32 1.0, %v1758_v43 }
0x10eb   :  { %v1760_v45 = vpop.eup %1759 }
0x10ec   :  { %v1298_v49 = vadd.f32 1.0, %v1760_v45  ;;  %v1299_v52 = vmul.f32 %v1297_v44, %v1283_v46 }
0x10ee   :  { %v1300_v54 = vmul.f32 %v1298_v49, %v1284_v25 }
0x10f0   :  { %v1301_v30 = vpack.c.bf16 %v1300_v54, %v1299_v52 }
0x10f2   :  { %1643 = vmatmul.mubr.msk.bf16.vlgmr.msra.gmra.mrb[28].mxu0 %vm663_vm3, %v1301_v30 }
0x11c5   :  { %v1367_v57 = vpop.f32.mrb[28].mxu0 }
0x11c6   :  { %v1368_v51 = vadd.f32 %v1367_v57, %v1305_v56  ;;  %v1644_v48 = vpop.f32.mrb[29].mxu0 }
0x11c7   :  { %v1370_v58 = vpop.f32.mrb[30].mxu0 }
0x11c8   :  { %v1371_v59 = vadd.f32 %v1370_v58, %v1305_v56  ;;  %v1645_v60 = vpop.f32.mrb[31].mxu0  ;;  %v1374_v63 = vadd.f32 %v1368_v51, %v1224_v33  ;;  %v1405_v33 = vrot.slane %v2105_v19, %v738_v61 }
0x11ca   :  { %v1376_v6 = vsel %vm66_vm1, %v1374_v63, 0.0  ;;  %v1375_v3 = vadd.f32 %v1371_v59, %v1225_v34 }
0x11cb   :  { %1377 = vadd.xlane.f32.xlu0 %v1376_v6 }
0x11cc   :  { %v1379_v15 = vsel %vm66_vm1, %v1375_v3, 0.0 }
0x11cd   :  { %1380 = vadd.xlane.f32.xlu1 %v1379_v15 }
0x1258   :  { %v1378_v35 = vpop.xlane.xlu0 %1377 }
0x1259   :  { %v1382_v8 = vmul.f32 0.03125, %v1378_v35 }
0x125a   :  { %v1381_v9 = vpop.xlane.xlu1 %1380 }
0x125b   :  { %v1384_v10 = vsub.f32 %v1374_v63, %v1382_v8  ;;  %v1383_v12 = vmul.f32 0.03125, %v1381_v9 }
0x125d   :  { %v1385_v20 = vsub.f32 %v1375_v3, %v1383_v12  ;;  %v1386_v13 = vmul.f32 %v1384_v10, %v1384_v10 }
0x125f   :  { %v1388_v14 = vsel %vm66_vm1, %v1386_v13, 0.0  ;;  %v1387_v4 = vmul.f32 %v1385_v20, %v1385_v20 }
0x1260   :  { %1389 = vadd.xlane.f32.xlu0 %v1388_v14 }
0x1261   :  { %v1391_v21 = vsel %vm66_vm1, %v1387_v4, 0.0 }
0x1262   :  { %1392 = vadd.xlane.f32.xlu1 %v1391_v21 }
0x12ed   :  { %v1390_v26 = vpop.xlane.xlu0 %1389 }
0x12ee   :  { %v1394_v17 = vmul.f32 0.03125, %v1390_v26 }
0x12ef   :  { %v1393_v47 = vpop.xlane.xlu1 %1392 }
0x12f0   :  { %v1396_v29 = vadd.f32 1e-05, %v1394_v17  ;;  %v1395_v31 = vmul.f32 0.03125, %v1393_v47 }
0x12f2   :  { %1761 = vrsqrt.f32 %v1396_v29  ;;  %v1397_v50 = vadd.f32 1e-05, %v1395_v31 }
0x12f4   :  { %1763 = vrsqrt.f32 %v1397_v50 }
0x12fc   :  { %v1762_v34 = vpop.eup %1761 }
0x12fd   :  { %v1400_v53 = vmul.f32 %v1762_v34, %v1384_v10 }
0x12fe   :  { %v1764_v28 = vpop.eup %1763 }
0x12ff   :  { %v1401_v32 = vmul.f32 %v1764_v28, %v1385_v20  ;;  %v1406_v37 = vmul.f32 %v1405_v33, %v1400_v53 }
0x1301   :  { %v1407_v18 = vmul.f32 %v1405_v33, %v1401_v32  ;;  %v1412_v38 = vadd.f32 %v1411_v36, %v1406_v37 }
0x1303   :  { %v1413_v23 = vadd.f32 %v1411_v36, %v1407_v18  ;;  %1414 = vst.msk [vmem:[#allocation2] sm:$0xff] %vm66_vm1, %v1412_v38 }
0x1305   :  { %1415 = vst.msk [vmem:[#allocation2 + $0x8] sm:$0xff] %vm66_vm1, %v1413_v23 }
0x1306   :  { %1776 = shalt.err (!%p1773_p4)
}
0x1307   :  { %s1777_s30 = scalar_lea.hbm %s2267_s6, 256 }
0x1308   :  { %p1778_p5 = scmp.ne.s32.totalorder %s2267_s6, %s1777_s30  ;;  %p1781_p6 = scmp.lt.u32.totalorder %s1777_s30, %s2267_s6 }
0x130a   :  { %p1783_p7 = pnand %p1781_p6, %p1778_p5 }
0x130c   :  { %1786 = shalt.err (!%p1783_p7)
}
0x130d   :  { %s1796_s10 = smov 128   ;;  %s1797_s11 = smov 8  }
0x130e   :  { %1427 = dma.vmem_to_hbm [thread:$0]  %s1422_s26, 256, %s2267_s6, [#allocation3], %s1796_s10, %s1796_s10, %s1797_s11  }
0x130f   :  { %1787 = dma.done.wait [#allocation3], 256  }
0x1310   :  { %1788 = vsyncadd [#allocation3], 4294967040 }
0x1311   :  { %1431 = vsyncpa [#allocation3], 1 }

</bundles_post_ra>
